<compile_context>
chip_gen: v7x
topology: tpu7x:2x2x1
jax: 0.10.0
libtpu: 0.0.40
codegen_flags: <defaults>
</compile_context>

<pallas_src>
import math

import jax
import jax.numpy as jnp
from jax.experimental import pallas as pl
from jax.experimental.pallas import tpu as pltpu

C = 32          # channels (GroupNorm(8, C) => C % 8 == 0)
L = 128         # sequence length (lane tile)
GROUPS = 8
EPS = 1e-5      # PyTorch GroupNorm default eps


# ----------------------------- chip heuristics --------------------------------

def _device_kind():
    try:
        return jax.devices()[0].device_kind.lower()
    except Exception:
        return ""


def _default_matmul_dtype():
    # bf16 MXU operands on v6e / v7x; keep f32 everywhere on v5e / unknown chips.
    kind = _device_kind()
    if "v6" in kind or "v7" in kind:
        return jnp.bfloat16
    return jnp.float32


def _min_grid_steps():
    # Only v7x has 2 TensorCores per chip; elsewhere a single big grid step is best.
    return 2 if "v7" in _device_kind() else 1


def _choose_nb(n, max_nb, min_steps):
    """Samples per grid step (batch is padded up to n_steps * nb in the wrapper)."""
    return max(1, min(max_nb, pl.cdiv(n, min_steps)))


# ------------------------------- the kernel -----------------------------------

def _make_kernel(Cc, nb, Ll):
    nbl = nb * Ll
    f32 = jnp.float32

    def kernel(xs_ref, t_ref, pv_ref, w1_ref, w2_ref, ag_ref, st_ref, o_ref):
        xs = xs_ref[...]                  # (C, nbl)  nb samples side by side (f32)
        agm = ag_ref[...]                 # (C, C)    group-mix matrix (pre-scaled)
        pv = pv_ref[...]                  # (C, 6)    packed per-channel vectors
        gg1, bb1, cb1 = pv[:, 0:1], pv[:, 1:2], pv[:, 2:3]
        gg2, bb2, cb2 = pv[:, 3:4], pv[:, 4:5], pv[:, 5:6]
        t_cn = t_ref[...]                 # (C, nb)
        st = st_ref[...]                  # (nb, nbl) 0/1 sample selection

        # Lane position within each sample (samples are contiguous Ll-lane chunks).
        pos = jax.lax.broadcasted_iota(jnp.int32, (1, nbl), 1) % Ll
        not_first = pos != 0
        not_last = pos != (Ll - 1)

        def seg_sum(v):                   # (C, nbl) -> (C, nb) per-sample lane sums
            if nb == 1:
                return jnp.sum(v, axis=1, keepdims=True)
            return jax.lax.dot_general(v, st, (((1,), (1,)), ((), ())),
                                       preferred_element_type=f32)

        def seg_bcast(v):                 # (C, nb) -> broadcastable vs (C, nbl)
            if nb == 1:
                return v
            return jnp.dot(v, st, preferred_element_type=f32)

        def group_norm(h, gamma, beta):
            s = seg_sum(h)                                        # (C, nb)
            ssq = seg_sum(h * h)
            # single group-mix matmul on the tiny (C, 2*nb) tensor
            stats = jnp.dot(agm, jnp.concatenate([s, ssq], axis=1),
                            preferred_element_type=f32)
            mean, meansq = stats[:, :nb], stats[:, nb:]
            var = jnp.maximum(meansq - mean * mean, 0.0)          # guard cancellation
            scale = jax.lax.rsqrt(var + EPS) * gamma              # (C, nb)
            shift = beta - mean * scale
            # single full-width multiply-add
            return h * seg_bcast(scale) + seg_bcast(shift)

        def conv3(h, w_ref):
            # Shifted taps via XLU roll + boundary masks (no cross-sample leakage),
            # three accumulating (C,C)@(C,nbl) dots -- no (3C, nbl) concat copy.
            hm1 = jnp.where(not_first, pltpu.roll(h, shift=1, axis=1), 0.0)
            hp1 = jnp.where(not_last, pltpu.roll(h, shift=nbl - 1, axis=1), 0.0)
            mmdt = w_ref.dtype
            out = jnp.dot(w_ref[0], hm1.astype(mmdt), preferred_element_type=f32)
            out = out + jnp.dot(w_ref[1], h.astype(mmdt), preferred_element_type=f32)
            out = out + jnp.dot(w_ref[2], hp1.astype(mmdt), preferred_element_type=f32)
            return out

        t2 = t_cn + cb1                                           # conv1 bias folded in
        h = jnp.maximum(group_norm(xs, gg1, bb1), 0.0)
        h = conv3(h, w1_ref)
        h = h + seg_bcast(t2)                                     # + (t_emb + b1)
        h = jnp.maximum(group_norm(h, gg2, bb2), 0.0)
        h = conv3(h, w2_ref) + cb2
        o_ref[...] = (h + xs).astype(o_ref.dtype)                 # residual

    return kernel


# ------------------------------ wrappers ---------------------------------------

def diffusion_block_cm(xt, t_cm, params, *, max_nb=16, matmul_dtype=None):
    """Channel-major path: xt (C, N*L), t_cm (C, N) -> (C, N*L).

    Use this across a stack of DiffusionBlocks so the (N,C,L) <-> (C, N*L)
    HBM relayout is paid once per stack instead of once per block.
    """
    if matmul_dtype is None:
        matmul_dtype = _default_matmul_dtype()
    g1, be1, w1, b1, g2, be2, w2, b2 = params
    Cc = xt.shape[0]
    N = t_cm.shape[1]
    Ll = xt.shape[1] // N
    assert xt.shape[1] == N * Ll
    assert Cc % GROUPS == 0 and Cc % 8 == 0, "channels must be a multiple of 8"
    assert Ll % 128 == 0, "sequence length must be a multiple of 128 (lane tile)"
    cg = Cc // GROUPS

    min_steps = _min_grid_steps()
    nb = _choose_nb(N, max_nb, min_steps)        # samples per grid step
    n_steps = pl.cdiv(N, nb)
    n_pad = n_steps * nb
    if n_pad != N:                               # pad awkward N instead of nb=1 fallback
        xt = jnp.pad(xt, ((0, 0), (0, (n_pad - N) * Ll)))
        t_cm = jnp.pad(t_cm, ((0, 0), (0, n_pad - N)))
    nbl = nb * Ll

    # per-step t_emb blocks: (steps, C, nb)
    t_blk = jnp.transpose(t_cm.reshape(Cc, n_steps, nb), (1, 0, 2))

    pvec = jnp.concatenate([g1, be1, b1, g2, be2, b2], axis=1)      # (C, 6)
    w1s = w1.astype(matmul_dtype)                                   # (3, C, C)
    w2s = w2.astype(matmul_dtype)

    # Group-mix matrix: (ag @ per_channel_sums) = per-channel group mean.
    gid = jnp.arange(Cc) // cg
    ag = (gid[:, None] == gid[None, :]).astype(jnp.float32) / float(cg * Ll)

    # 0/1 sample-selection matrix for segmented lane sums / broadcasts.
    if nb > 1:
        lane = jnp.arange(nbl)
        smat = (lane[None, :] // Ll == jnp.arange(nb)[:, None]).astype(jnp.float32)
    else:
        smat = jnp.ones((1, Ll), jnp.float32)

    out_t = pl.pallas_call(
        _make_kernel(Cc, nb, Ll),
        out_shape=jax.ShapeDtypeStruct((Cc, n_pad * Ll), xt.dtype),
        grid_spec=pltpu.PrefetchScalarGridSpec(
            num_scalar_prefetch=0,
            grid=(n_steps,),
            in_specs=[
                pl.BlockSpec((Cc, nbl), lambda i: (0, i)),           # x slab
                pl.BlockSpec((None, Cc, nb), lambda i: (i, 0, 0)),   # t_emb (leading dim squeezed)
                pl.BlockSpec((Cc, 6), lambda i: (0, 0)),             # packed gamma/beta/bias
                pl.BlockSpec((3, Cc, Cc), lambda i: (0, 0, 0)),      # conv1 weights (k, Cout, Cin)
                pl.BlockSpec((3, Cc, Cc), lambda i: (0, 0, 0)),      # conv2 weights
                pl.BlockSpec((Cc, Cc), lambda i: (0, 0)),            # group-mix matrix
                pl.BlockSpec((nb, nbl), lambda i: (0, 0)),           # sample selection
            ],
            out_specs=pl.BlockSpec((Cc, nbl), lambda i: (0, i)),
        ),
        compiler_params=pltpu.CompilerParams(
            dimension_semantics=("parallel",)),
    )(xt, t_blk, pvec, w1s, w2s, ag, smat)

    if n_pad != N:
        out_t = out_t[:, : N * Ll]
    return out_t


def diffusion_block(x, t_emb, params, *, max_nb=16, matmul_dtype=None):
    """x: (N, C, L) f32, t_emb: (N, C) f32  ->  (N, C, L)."""
    N, Cc, Ll = x.shape
    xt = jnp.transpose(x, (1, 0, 2)).reshape(Cc, N * Ll)            # (C, N*L)
    t_cm = jnp.transpose(t_emb, (1, 0))                             # (C, N)
    out_t = diffusion_block_cm(xt, t_cm, params, max_nb=max_nb,
                               matmul_dtype=matmul_dtype)
    return jnp.transpose(out_t.reshape(Cc, N, Ll), (1, 0, 2))       # back to (N, C, L)


# --------------------------- plain-JAX reference -------------------------------

def ref_forward(x, t_emb, params):
    g1, be1, w1, b1, g2, be2, w2, b2 = params

    def gn(h, gamma, beta):
        n, cc, ll = h.shape
        hg = h.reshape(n, GROUPS, cc // GROUPS, ll)
        mean = hg.mean(axis=(2, 3), keepdims=True)
        var = ((hg - mean) ** 2).mean(axis=(2, 3), keepdims=True)
        hn = ((hg - mean) / jnp.sqrt(var + EPS)).reshape(n, cc, ll)
        return hn * gamma[None] + beta[None]

    def conv(h, w, b):
        wk = jnp.transpose(w, (1, 2, 0))   # (Cout, Cin, 3)
        out = jax.lax.conv_general_dilated(
            h, wk, window_strides=(1,), padding=((1, 1),),
            dimension_numbers=("NCH", "OIH", "NCH"))
        return out + b[None]

    h = conv(jnp.maximum(gn(x, g1, be1), 0.0), w1, b1)
    h = h + t_emb[:, :, None]
    h = conv(jnp.maximum(gn(h, g2, be2), 0.0), w2, b2)
    return h + x


# ---------------------------------- main ----------------------------------------

if __name__ == "__main__":
    key = jax.random.PRNGKey(0)
    ks = jax.random.split(key, 8)

    # Deterministic parameter init (PyTorch Conv1d-style uniform bounds; random
    # gamma/beta so the affine path is actually exercised).
    bound = 1.0 / math.sqrt(C * 3)
    w1 = jax.random.uniform(ks[0], (3, C, C), jnp.float32, -bound, bound)
    b1 = jax.random.uniform(ks[1], (C, 1), jnp.float32, -bound, bound)
    w2 = jax.random.uniform(ks[2], (3, C, C), jnp.float32, -bound, bound)
    b2 = jax.random.uniform(ks[3], (C, 1), jnp.float32, -bound, bound)
    g1 = 1.0 + 0.1 * jax.random.normal(ks[4], (C, 1), jnp.float32)
    be1 = 0.1 * jax.random.normal(ks[5], (C, 1), jnp.float32)
    g2 = 1.0 + 0.1 * jax.random.normal(ks[6], (C, 1), jnp.float32)
    be2 = 0.1 * jax.random.normal(ks[7], (C, 1), jnp.float32)
    params = (g1, be1, w1, b1, g2, be2, w2, b2)

    # Configs:
    #  * N=2 / N=8, f32 conv matmuls, tight tolerance (exercises nb>1 folded batch).
    #  * N=5, max_nb=4, bf16 conv matmuls, loose tolerance (exercises batch padding
    #    and the reduced-precision MXU path; stats/residual remain f32).
    configs = [
        (2, 16, jnp.float32, 2e-4, 2e-4),
        (8, 16, jnp.float32, 2e-4, 2e-4),
        (5, 4, jnp.bfloat16, 1e-1, 1e-1),
    ]
    for cfg_idx, (N, max_nb, mmdt, atol, rtol) in enumerate(configs):
        kx, kt = jax.random.split(jax.random.fold_in(key, cfg_idx))
        x = jax.random.normal(kx, (N, C, L), jnp.float32)
        t_emb = jax.random.normal(kt, (N, C), jnp.float32)

        out = jax.block_until_ready(
            diffusion_block(x, t_emb, params, max_nb=max_nb, matmul_dtype=mmdt))
        ref = ref_forward(x, t_emb, params)

        assert out.shape == (N, C, L)
        err = float(jnp.max(jnp.abs(out - ref)))
        assert jnp.allclose(out, ref, atol=atol, rtol=rtol), (
            f"N={N} dtype={mmdt}: max abs err {err}")

    print("KERNEL_OK")
</pallas_src>

<mosaic_0001>
module attributes {stable_mosaic.version = 11 : i64} {
  func.func @kernel(%arg0: i32, %arg1: memref<32x256xf32, #tpu.memory_space<vmem>>, %arg2: memref<1x32x2xf32, #tpu.memory_space<vmem>>, %arg3: memref<32x6xf32, #tpu.memory_space<vmem>>, %arg4: memref<3x32x32xf32, #tpu.memory_space<vmem>>, %arg5: memref<3x32x32xf32, #tpu.memory_space<vmem>>, %arg6: memref<32x32xf32, #tpu.memory_space<vmem>>, %arg7: memref<2x256xf32, #tpu.memory_space<vmem>>, %arg8: memref<32x256xf32, #tpu.memory_space<vmem>>) attributes {dimension_semantics = [#tpu.dimension_semantics<parallel>], iteration_bounds = array<i64: 1>, scalar_prefetch = 0 : i64, scratch_operands = 0 : i64, tpu.core_type = #tpu.core_type<tc>, window_params = [{transform_indices = @transform_0, window_bounds = array<i64: 32, 256>}, {transform_indices = @transform_1, window_bounds = array<i64: 1, 32, 2>}, {pipeline_mode = #tpu.pipeline_mode<synchronous>, transform_indices = @transform_2, window_bounds = array<i64: 32, 6>}, {pipeline_mode = #tpu.pipeline_mode<synchronous>, transform_indices = @transform_3, window_bounds = array<i64: 3, 32, 32>}, {pipeline_mode = #tpu.pipeline_mode<synchronous>, transform_indices = @transform_4, window_bounds = array<i64: 3, 32, 32>}, {pipeline_mode = #tpu.pipeline_mode<synchronous>, transform_indices = @transform_5, window_bounds = array<i64: 32, 32>}, {pipeline_mode = #tpu.pipeline_mode<synchronous>, transform_indices = @transform_6, window_bounds = array<i64: 2, 256>}, {transform_indices = @transform_7, window_bounds = array<i64: 32, 256>}]} {
    %c0 = arith.constant 0 : index
    %c0_0 = arith.constant 0 : index
    %0 = vector.load %arg1[%c0, %c0_0] : memref<32x256xf32, #tpu.memory_space<vmem>>, vector<32x256xf32>
    %c0_1 = arith.constant 0 : index
    %c0_2 = arith.constant 0 : index
    %1 = vector.load %arg6[%c0_1, %c0_2] : memref<32x32xf32, #tpu.memory_space<vmem>>, vector<32x32xf32>
    %c0_3 = arith.constant 0 : index
    %c0_4 = arith.constant 0 : index
    %2 = vector.load %arg3[%c0_3, %c0_4] : memref<32x6xf32, #tpu.memory_space<vmem>>, vector<32x6xf32>
    %3 = vector.extract_strided_slice %2 {offsets = [0, 0], sizes = [32, 1], strides = [1, 1]} : vector<32x6xf32> to vector<32x1xf32>
    %4 = vector.extract_strided_slice %2 {offsets = [0, 1], sizes = [32, 1], strides = [1, 1]} : vector<32x6xf32> to vector<32x1xf32>
    %5 = vector.extract_strided_slice %2 {offsets = [0, 2], sizes = [32, 1], strides = [1, 1]} : vector<32x6xf32> to vector<32x1xf32>
    %6 = vector.extract_strided_slice %2 {offsets = [0, 3], sizes = [32, 1], strides = [1, 1]} : vector<32x6xf32> to vector<32x1xf32>
    %7 = vector.extract_strided_slice %2 {offsets = [0, 4], sizes = [32, 1], strides = [1, 1]} : vector<32x6xf32> to vector<32x1xf32>
    %8 = vector.extract_strided_slice %2 {offsets = [0, 5], sizes = [32, 1], strides = [1, 1]} : vector<32x6xf32> to vector<32x1xf32>
    %c0_5 = arith.constant 0 : index
    %c0_6 = arith.constant 0 : index
    %c0_7 = arith.constant 0 : index
    %9 = vector.load %arg2[%c0_5, %c0_6, %c0_7] : memref<1x32x2xf32, #tpu.memory_space<vmem>>, vector<1x32x2xf32>
    %10 = vector.shape_cast %9 : vector<1x32x2xf32> to vector<32x2xf32>
    %c0_8 = arith.constant 0 : index
    %c0_9 = arith.constant 0 : index
    %11 = vector.load %arg7[%c0_8, %c0_9] : memref<2x256xf32, #tpu.memory_space<vmem>>, vector<2x256xf32>
    %12 = tpu.iota {dimensions = array<i32: 1>} : vector<1x256xi32>
    %c128_i32 = arith.constant 128 : i32
    %c0_i32 = arith.constant 0 : i32
    %13 = arith.cmpi eq, %c128_i32, %c0_i32 : i32
    %c1_i32 = arith.constant 1 : i32
    %14 = arith.select %13, %c1_i32, %c128_i32 : i32
    %15 = vector.broadcast %14 : i32 to vector<1x256xi32>
    %16 = arith.remsi %12, %15 : vector<1x256xi32>
    %c0_i32_10 = arith.constant 0 : i32
    %17 = vector.broadcast %c0_i32_10 : i32 to vector<1x256xi32>
    %18 = arith.cmpi ne, %16, %17 : vector<1x256xi32>
    %c0_i32_11 = arith.constant 0 : i32
    %19 = vector.broadcast %c0_i32_11 : i32 to vector<1x256xi32>
    %20 = arith.cmpi slt, %16, %19 : vector<1x256xi32>
    %c0_i32_12 = arith.constant 0 : i32
    %21 = arith.cmpi slt, %14, %c0_i32_12 : i32
    %22 = vector.broadcast %21 : i1 to vector<1x256xi1>
    %23 = vector.broadcast %22 : vector<1x256xi1> to vector<1x256xi1>
    %24 = arith.xori %20, %23 : vector<1x256xi1>
    %25 = arith.andi %24, %18 : vector<1x256xi1>
    %26 = vector.broadcast %14 : i32 to vector<1x256xi32>
    %27 = arith.addi %16, %26 : vector<1x256xi32>
    %28 = arith.select %25, %27, %16 : vector<1x256xi1>, vector<1x256xi32>
    %c0_i32_13 = arith.constant 0 : i32
    %29 = vector.broadcast %c0_i32_13 : i32 to vector<1x256xi32>
    %30 = arith.cmpi ne, %28, %29 : vector<1x256xi32>
    %c127_i32 = arith.constant 127 : i32
    %31 = vector.broadcast %c127_i32 : i32 to vector<1x256xi32>
    %32 = arith.cmpi ne, %28, %31 : vector<1x256xi32>
    %33 = vector.broadcast %5 : vector<32x1xf32> to vector<32x2xf32>
    %34 = arith.addf %10, %33 : vector<32x2xf32>
    %cst = arith.constant dense<0.000000e+00> : vector<32x2xf32>
    %35 = tpu.matmul %0, %11, %cst {dimension_numbers = #tpu.dot_dimension_numbers<[1], [1], [0], [0], [0, 0, 1, 0], [], []>} : vector<32x256xf32>, vector<2x256xf32>, vector<32x2xf32> -> vector<32x2xf32>
    %36 = arith.mulf %0, %0 : vector<32x256xf32>
    %cst_14 = arith.constant dense<0.000000e+00> : vector<32x2xf32>
    %37 = tpu.matmul %36, %11, %cst_14 {dimension_numbers = #tpu.dot_dimension_numbers<[1], [1], [0], [0], [0, 0, 1, 0], [], []>} : vector<32x256xf32>, vector<2x256xf32>, vector<32x2xf32> -> vector<32x2xf32>
    %38 = tpu.concatenate %35, %37 in 1 : vector<32x2xf32>, vector<32x2xf32> -> vector<32x4xf32>
    %cst_15 = arith.constant dense<0.000000e+00> : vector<32x4xf32>
    %39 = tpu.matmul %1, %38, %cst_15 {dimension_numbers = #tpu.dot_dimension_numbers<[1], [0], [0], [1], [0, 0, 1, 1], [], []>} : vector<32x32xf32>, vector<32x4xf32>, vector<32x4xf32> -> vector<32x4xf32>
    %40 = vector.extract_strided_slice %39 {offsets = [0, 0], sizes = [32, 2], strides = [1, 1]} : vector<32x4xf32> to vector<32x2xf32>
    %41 = vector.extract_strided_slice %39 {offsets = [0, 2], sizes = [32, 2], strides = [1, 1]} : vector<32x4xf32> to vector<32x2xf32>
    %42 = arith.mulf %40, %40 : vector<32x2xf32>
    %43 = arith.subf %41, %42 : vector<32x2xf32>
    %cst_16 = arith.constant 0.000000e+00 : f32
    %44 = vector.broadcast %cst_16 : f32 to vector<32x2xf32>
    %45 = arith.maximumf %43, %44 : vector<32x2xf32>
    %cst_17 = arith.constant 9.99999974E-6 : f32
    %46 = vector.broadcast %cst_17 : f32 to vector<32x2xf32>
    %47 = arith.addf %45, %46 : vector<32x2xf32>
    %48 = math.rsqrt %47 : vector<32x2xf32>
    %49 = vector.broadcast %3 : vector<32x1xf32> to vector<32x2xf32>
    %50 = arith.mulf %48, %49 : vector<32x2xf32>
    %51 = arith.mulf %40, %50 : vector<32x2xf32>
    %52 = vector.broadcast %4 : vector<32x1xf32> to vector<32x2xf32>
    %53 = arith.subf %52, %51 : vector<32x2xf32>
    %cst_18 = arith.constant dense<0.000000e+00> : vector<32x256xf32>
    %54 = tpu.matmul %50, %11, %cst_18 {dimension_numbers = #tpu.dot_dimension_numbers<[1], [0], [0], [1], [0, 0, 1, 1], [], []>} : vector<32x2xf32>, vector<2x256xf32>, vector<32x256xf32> -> vector<32x256xf32>
    %55 = arith.mulf %0, %54 : vector<32x256xf32>
    %cst_19 = arith.constant dense<0.000000e+00> : vector<32x256xf32>
    %56 = tpu.matmul %53, %11, %cst_19 {dimension_numbers = #tpu.dot_dimension_numbers<[1], [0], [0], [1], [0, 0, 1, 1], [], []>} : vector<32x2xf32>, vector<2x256xf32>, vector<32x256xf32> -> vector<32x256xf32>
    %57 = arith.addf %55, %56 : vector<32x256xf32>
    %cst_20 = arith.constant 0.000000e+00 : f32
    %58 = vector.broadcast %cst_20 : f32 to vector<32x256xf32>
    %59 = arith.maximumf %57, %58 : vector<32x256xf32>
    %c1_i32_21 = arith.constant 1 : i32
    %60 = tpu.dynamic_rotate %59 by %c1_i32_21 dim 1 : vector<32x256xf32>, i32 -> vector<32x256xf32>
    %cst_22 = arith.constant 0.000000e+00 : f32
    %61 = vector.shape_cast %30 : vector<1x256xi1> to vector<1x256xi1>
    %62 = vector.broadcast %61 : vector<1x256xi1> to vector<32x256xi1>
    %63 = vector.broadcast %cst_22 : f32 to vector<32x256xf32>
    %64 = arith.select %62, %60, %63 : vector<32x256xi1>, vector<32x256xf32>
    %c255_i32 = arith.constant 255 : i32
    %65 = tpu.dynamic_rotate %59 by %c255_i32 dim 1 : vector<32x256xf32>, i32 -> vector<32x256xf32>
    %cst_23 = arith.constant 0.000000e+00 : f32
    %66 = vector.shape_cast %32 : vector<1x256xi1> to vector<1x256xi1>
    %67 = vector.broadcast %66 : vector<1x256xi1> to vector<32x256xi1>
    %68 = vector.broadcast %cst_23 : f32 to vector<32x256xf32>
    %69 = arith.select %67, %65, %68 : vector<32x256xi1>, vector<32x256xf32>
    %c0_24 = arith.constant 0 : index
    %c0_25 = arith.constant 0 : index
    %c0_26 = arith.constant 0 : index
    %70 = vector.load %arg4[%c0_24, %c0_25, %c0_26] : memref<3x32x32xf32, #tpu.memory_space<vmem>>, vector<1x32x32xf32>
    %71 = vector.shape_cast %70 : vector<1x32x32xf32> to vector<32x32xf32>
    %cst_27 = arith.constant dense<0.000000e+00> : vector<32x256xf32>
    %72 = tpu.matmul %71, %64, %cst_27 {dimension_numbers = #tpu.dot_dimension_numbers<[1], [0], [0], [1], [0, 0, 1, 1], [], []>} : vector<32x32xf32>, vector<32x256xf32>, vector<32x256xf32> -> vector<32x256xf32>
    %c1 = arith.constant 1 : index
    %c0_28 = arith.constant 0 : index
    %c0_29 = arith.constant 0 : index
    %73 = vector.load %arg4[%c1, %c0_28, %c0_29] : memref<3x32x32xf32, #tpu.memory_space<vmem>>, vector<1x32x32xf32>
    %74 = vector.shape_cast %73 : vector<1x32x32xf32> to vector<32x32xf32>
    %cst_30 = arith.constant dense<0.000000e+00> : vector<32x256xf32>
    %75 = tpu.matmul %74, %59, %cst_30 {dimension_numbers = #tpu.dot_dimension_numbers<[1], [0], [0], [1], [0, 0, 1, 1], [], []>} : vector<32x32xf32>, vector<32x256xf32>, vector<32x256xf32> -> vector<32x256xf32>
    %76 = arith.addf %72, %75 : vector<32x256xf32>
    %c2 = arith.constant 2 : index
    %c0_31 = arith.constant 0 : index
    %c0_32 = arith.constant 0 : index
    %77 = vector.load %arg4[%c2, %c0_31, %c0_32] : memref<3x32x32xf32, #tpu.memory_space<vmem>>, vector<1x32x32xf32>
    %78 = vector.shape_cast %77 : vector<1x32x32xf32> to vector<32x32xf32>
    %cst_33 = arith.constant dense<0.000000e+00> : vector<32x256xf32>
    %79 = tpu.matmul %78, %69, %cst_33 {dimension_numbers = #tpu.dot_dimension_numbers<[1], [0], [0], [1], [0, 0, 1, 1], [], []>} : vector<32x32xf32>, vector<32x256xf32>, vector<32x256xf32> -> vector<32x256xf32>
    %80 = arith.addf %76, %79 : vector<32x256xf32>
    %cst_34 = arith.constant dense<0.000000e+00> : vector<32x256xf32>
    %81 = tpu.matmul %34, %11, %cst_34 {dimension_numbers = #tpu.dot_dimension_numbers<[1], [0], [0], [1], [0, 0, 1, 1], [], []>} : vector<32x2xf32>, vector<2x256xf32>, vector<32x256xf32> -> vector<32x256xf32>
    %82 = arith.addf %80, %81 : vector<32x256xf32>
    %cst_35 = arith.constant dense<0.000000e+00> : vector<32x2xf32>
    %83 = tpu.matmul %82, %11, %cst_35 {dimension_numbers = #tpu.dot_dimension_numbers<[1], [1], [0], [0], [0, 0, 1, 0], [], []>} : vector<32x256xf32>, vector<2x256xf32>, vector<32x2xf32> -> vector<32x2xf32>
    %84 = arith.mulf %82, %82 : vector<32x256xf32>
    %cst_36 = arith.constant dense<0.000000e+00> : vector<32x2xf32>
    %85 = tpu.matmul %84, %11, %cst_36 {dimension_numbers = #tpu.dot_dimension_numbers<[1], [1], [0], [0], [0, 0, 1, 0], [], []>} : vector<32x256xf32>, vector<2x256xf32>, vector<32x2xf32> -> vector<32x2xf32>
    %86 = tpu.concatenate %83, %85 in 1 : vector<32x2xf32>, vector<32x2xf32> -> vector<32x4xf32>
    %cst_37 = arith.constant dense<0.000000e+00> : vector<32x4xf32>
    %87 = tpu.matmul %1, %86, %cst_37 {dimension_numbers = #tpu.dot_dimension_numbers<[1], [0], [0], [1], [0, 0, 1, 1], [], []>} : vector<32x32xf32>, vector<32x4xf32>, vector<32x4xf32> -> vector<32x4xf32>
    %88 = vector.extract_strided_slice %87 {offsets = [0, 0], sizes = [32, 2], strides = [1, 1]} : vector<32x4xf32> to vector<32x2xf32>
    %89 = vector.extract_strided_slice %87 {offsets = [0, 2], sizes = [32, 2], strides = [1, 1]} : vector<32x4xf32> to vector<32x2xf32>
    %90 = arith.mulf %88, %88 : vector<32x2xf32>
    %91 = arith.subf %89, %90 : vector<32x2xf32>
    %cst_38 = arith.constant 0.000000e+00 : f32
    %92 = vector.broadcast %cst_38 : f32 to vector<32x2xf32>
    %93 = arith.maximumf %91, %92 : vector<32x2xf32>
    %cst_39 = arith.constant 9.99999974E-6 : f32
    %94 = vector.broadcast %cst_39 : f32 to vector<32x2xf32>
    %95 = arith.addf %93, %94 : vector<32x2xf32>
    %96 = math.rsqrt %95 : vector<32x2xf32>
    %97 = vector.broadcast %6 : vector<32x1xf32> to vector<32x2xf32>
    %98 = arith.mulf %96, %97 : vector<32x2xf32>
    %99 = arith.mulf %88, %98 : vector<32x2xf32>
    %100 = vector.broadcast %7 : vector<32x1xf32> to vector<32x2xf32>
    %101 = arith.subf %100, %99 : vector<32x2xf32>
    %cst_40 = arith.constant dense<0.000000e+00> : vector<32x256xf32>
    %102 = tpu.matmul %98, %11, %cst_40 {dimension_numbers = #tpu.dot_dimension_numbers<[1], [0], [0], [1], [0, 0, 1, 1], [], []>} : vector<32x2xf32>, vector<2x256xf32>, vector<32x256xf32> -> vector<32x256xf32>
    %103 = arith.mulf %82, %102 : vector<32x256xf32>
    %cst_41 = arith.constant dense<0.000000e+00> : vector<32x256xf32>
    %104 = tpu.matmul %101, %11, %cst_41 {dimension_numbers = #tpu.dot_dimension_numbers<[1], [0], [0], [1], [0, 0, 1, 1], [], []>} : vector<32x2xf32>, vector<2x256xf32>, vector<32x256xf32> -> vector<32x256xf32>
    %105 = arith.addf %103, %104 : vector<32x256xf32>
    %cst_42 = arith.constant 0.000000e+00 : f32
    %106 = vector.broadcast %cst_42 : f32 to vector<32x256xf32>
    %107 = arith.maximumf %105, %106 : vector<32x256xf32>
    %c1_i32_43 = arith.constant 1 : i32
    %108 = tpu.dynamic_rotate %107 by %c1_i32_43 dim 1 : vector<32x256xf32>, i32 -> vector<32x256xf32>
    %cst_44 = arith.constant 0.000000e+00 : f32
    %109 = vector.shape_cast %30 : vector<1x256xi1> to vector<1x256xi1>
    %110 = vector.broadcast %109 : vector<1x256xi1> to vector<32x256xi1>
    %111 = vector.broadcast %cst_44 : f32 to vector<32x256xf32>
    %112 = arith.select %110, %108, %111 : vector<32x256xi1>, vector<32x256xf32>
    %c255_i32_45 = arith.constant 255 : i32
    %113 = tpu.dynamic_rotate %107 by %c255_i32_45 dim 1 : vector<32x256xf32>, i32 -> vector<32x256xf32>
    %cst_46 = arith.constant 0.000000e+00 : f32
    %114 = vector.shape_cast %32 : vector<1x256xi1> to vector<1x256xi1>
    %115 = vector.broadcast %114 : vector<1x256xi1> to vector<32x256xi1>
    %116 = vector.broadcast %cst_46 : f32 to vector<32x256xf32>
    %117 = arith.select %115, %113, %116 : vector<32x256xi1>, vector<32x256xf32>
    %c0_47 = arith.constant 0 : index
    %c0_48 = arith.constant 0 : index
    %c0_49 = arith.constant 0 : index
    %118 = vector.load %arg5[%c0_47, %c0_48, %c0_49] : memref<3x32x32xf32, #tpu.memory_space<vmem>>, vector<1x32x32xf32>
    %119 = vector.shape_cast %118 : vector<1x32x32xf32> to vector<32x32xf32>
    %cst_50 = arith.constant dense<0.000000e+00> : vector<32x256xf32>
    %120 = tpu.matmul %119, %112, %cst_50 {dimension_numbers = #tpu.dot_dimension_numbers<[1], [0], [0], [1], [0, 0, 1, 1], [], []>} : vector<32x32xf32>, vector<32x256xf32>, vector<32x256xf32> -> vector<32x256xf32>
    %c1_51 = arith.constant 1 : index
    %c0_52 = arith.constant 0 : index
    %c0_53 = arith.constant 0 : index
    %121 = vector.load %arg5[%c1_51, %c0_52, %c0_53] : memref<3x32x32xf32, #tpu.memory_space<vmem>>, vector<1x32x32xf32>
    %122 = vector.shape_cast %121 : vector<1x32x32xf32> to vector<32x32xf32>
    %cst_54 = arith.constant dense<0.000000e+00> : vector<32x256xf32>
    %123 = tpu.matmul %122, %107, %cst_54 {dimension_numbers = #tpu.dot_dimension_numbers<[1], [0], [0], [1], [0, 0, 1, 1], [], []>} : vector<32x32xf32>, vector<32x256xf32>, vector<32x256xf32> -> vector<32x256xf32>
    %124 = arith.addf %120, %123 : vector<32x256xf32>
    %c2_55 = arith.constant 2 : index
    %c0_56 = arith.constant 0 : index
    %c0_57 = arith.constant 0 : index
    %125 = vector.load %arg5[%c2_55, %c0_56, %c0_57] : memref<3x32x32xf32, #tpu.memory_space<vmem>>, vector<1x32x32xf32>
    %126 = vector.shape_cast %125 : vector<1x32x32xf32> to vector<32x32xf32>
    %cst_58 = arith.constant dense<0.000000e+00> : vector<32x256xf32>
    %127 = tpu.matmul %126, %117, %cst_58 {dimension_numbers = #tpu.dot_dimension_numbers<[1], [0], [0], [1], [0, 0, 1, 1], [], []>} : vector<32x32xf32>, vector<32x256xf32>, vector<32x256xf32> -> vector<32x256xf32>
    %128 = arith.addf %124, %127 : vector<32x256xf32>
    %129 = vector.broadcast %8 : vector<32x1xf32> to vector<32x256xf32>
    %130 = arith.addf %128, %129 : vector<32x256xf32>
    %131 = arith.addf %130, %0 : vector<32x256xf32>
    %c0_59 = arith.constant 0 : index
    %c0_60 = arith.constant 0 : index
    %132 = vector.load %arg8[%c0_59, %c0_60] : memref<32x256xf32, #tpu.memory_space<vmem>>, vector<32x256xf32>
    tpu.vector_store %arg8[%c0_59, %c0_60], %131 {strides = array<i32>} : memref<32x256xf32, #tpu.memory_space<vmem>>, vector<32x256xf32>,
    return
  }
  func.func @transform_0(%arg0: i32) -> (i32, i32) {
    %c0_i32 = arith.constant 0 : i32
    %c0_i32_0 = arith.constant 0 : i32
    return %c0_i32, %arg0 : i32, i32
  }
  func.func @transform_1(%arg0: i32) -> (i32, i32, i32) {
    %c0_i32 = arith.constant 0 : i32
    %c0_i32_0 = arith.constant 0 : i32
    %c0_i32_1 = arith.constant 0 : i32
    return %arg0, %c0_i32, %c0_i32_0 : i32, i32, i32
  }
  func.func @transform_2(%arg0: i32) -> (i32, i32) {
    %c0_i32 = arith.constant 0 : i32
    %c0_i32_0 = arith.constant 0 : i32
    %c0_i32_1 = arith.constant 0 : i32
    return %c0_i32, %c0_i32_0 : i32, i32
  }
  func.func @transform_3(%arg0: i32) -> (i32, i32, i32) {
    %c0_i32 = arith.constant 0 : i32
    %c0_i32_0 = arith.constant 0 : i32
    %c0_i32_1 = arith.constant 0 : i32
    %c0_i32_2 = arith.constant 0 : i32
    return %c0_i32, %c0_i32_0, %c0_i32_1 : i32, i32, i32
  }
  func.func @transform_4(%arg0: i32) -> (i32, i32, i32) {
    %c0_i32 = arith.constant 0 : i32
    %c0_i32_0 = arith.constant 0 : i32
    %c0_i32_1 = arith.constant 0 : i32
    %c0_i32_2 = arith.constant 0 : i32
    return %c0_i32, %c0_i32_0, %c0_i32_1 : i32, i32, i32
  }
  func.func @transform_5(%arg0: i32) -> (i32, i32) {
    %c0_i32 = arith.constant 0 : i32
    %c0_i32_0 = arith.constant 0 : i32
    %c0_i32_1 = arith.constant 0 : i32
    return %c0_i32, %c0_i32_0 : i32, i32
  }
  func.func @transform_6(%arg0: i32) -> (i32, i32) {
    %c0_i32 = arith.constant 0 : i32
    %c0_i32_0 = arith.constant 0 : i32
    %c0_i32_1 = arith.constant 0 : i32
    return %c0_i32, %c0_i32_0 : i32, i32
  }
  func.func @transform_7(%arg0: i32) -> (i32, i32) {
    %c0_i32 = arith.constant 0 : i32
    %c0_i32_0 = arith.constant 0 : i32
    return %c0_i32, %arg0 : i32, i32
  }
}

</mosaic_0001>

<bundles_post_ra>
// kernel: tpu_custom_call.1
= control target key start
LH: loop header
LB: loop body
LE: loop exit
PB: predicated region body
PF: predicated region fallthrough
CT: control target
= control target key end

     0   :  { %12 = vsyncpa [#allocation3], 0  ;;  %s3544_s0 = inlined_call_operand.vmem [shape: f32[32,256], index: 0, kind: input, shape index: {}]   ;;  %s3545_s1 = inlined_call_operand.vmem [shape: f32[1,32,2], index: 1, kind: input, shape index: {}]   ;;  %s3546_s2 = inlined_call_operand.vmem [shape: f32[32,6], index: 2, kind: input, shape index: {}]   ;;  %s3547_s3 = inlined_call_operand.hbm [shape: f32[3,32,32], index: 3, kind: input, shape index: {}]   ;;  %s3548_s4 = inlined_call_operand.hbm [shape: f32[3,32,32], index: 4, kind: input, shape index: {}]   ;;  %s3549_s5 = inlined_call_operand.hbm [shape: f32[32,32], index: 5, kind: input, shape index: {}]   ;;  %s3550_s6 = inlined_call_operand.vmem [shape: f32[2,256], index: 6, kind: input, shape index: {}]   ;;  %s3551_s7 = inlined_call_operand.hbm [shape: f32[32,256], index: 7, kind: output, shape index: {}]  }
   0x1   :  { %13 = vsyncpa [#allocation6], 0 }
   0x2   :  { %14 = vsyncpa [#allocation4], 0  ;;  %s2844_s24 = smov [#allocation5]   ;;  %s2845_s26 = smov [#allocation2]  }
   0x3   :  { %s38_s25 = sshll.u32 %s2844_s24, 4  ;;  %s26_s27 = sshll.u32 %s2845_s26, 4  ;;  %s39_s25 = int_to_ptr.vmem [resolvable:$true] %s38_s25  ;;  %s2903_s27 = int_to_ptr.vmem [resolvable:$true] %s26_s27 }
   0x4   :  { %s2750_s30 = scalar_lea.hbm %s3548_s4, 1536 }
   0x5   :  { %p2751_p0 = scmp.ne.s32.totalorder %s3548_s4, %s2750_s30  ;;  %p2754_p1 = scmp.lt.u32.totalorder %s2750_s30, %s3548_s4 }
   0x7   :  { %p2756_p2 = pnand %p2754_p1, %p2751_p0 }
   0x9   :  { %2759 = shalt.err (!%p2756_p2)
}
   0xa   :  { %s2760_s12 = scalar_lea.vmem %s39_s25, 1536  ;;  %p2765_p4 = scmp.lt.s32.totalorder %s39_s25, %s39_s25 }
   0xb   :  { %p2761_p3 = scmp.ne.s32.totalorder %s39_s25, %s2760_s12  ;;  %p2766_p5 = scmp.lt.s32.totalorder %s2760_s12, %s2760_s12 }
   0xd   :  { %p2767_p6 = por %p2766_p5, %p2765_p4 }
   0xf   :  { %p2768_p7 = pnand %p2767_p6, %p2761_p3 }
  0x11   :  { %2771 = shalt.err (!%p2768_p7)
}
  0x12   :  { %s2846_s13 = smov 128   ;;  %s2847_s14 = smov 8  }
  0x13   :  { %44 = dma.hbm_to_vmem [thread:$0]  %s3548_s4, 1536, %s39_s25, [#allocation6], %s2846_s13, %s2846_s13, %s2847_s14  }
  0x14   :  { %s2772_s19 = scalar_lea.hbm %s3547_s3, 1536 }
  0x15   :  { %p2773_p8 = scmp.ne.s32.totalorder %s3547_s3, %s2772_s19  ;;  %p2776_p9 = scmp.lt.u32.totalorder %s2772_s19, %s3547_s3 }
  0x17   :  { %p2778_p10 = pnand %p2776_p9, %p2773_p8 }
  0x19   :  { %2781 = shalt.err (!%p2778_p10)
}
  0x1a   :  { %s2782_s24 = scalar_lea.vmem %s2903_s27, 1536  ;;  %p2787_p12 = scmp.lt.s32.totalorder %s2903_s27, %s2903_s27 }
  0x1b   :  { %p2783_p11 = scmp.ne.s32.totalorder %s2903_s27, %s2782_s24  ;;  %p2788_p13 = scmp.lt.s32.totalorder %s2782_s24, %s2782_s24 }
  0x1d   :  { %p2789_p0 = por %p2788_p13, %p2787_p12 }
  0x1f   :  { %p2790_p1 = pnand %p2789_p0, %p2783_p11 }
  0x21   :  { %2793 = shalt.err (!%p2790_p1)
}
  0x22   :  { %32 = dma.hbm_to_vmem [thread:$0]  %s3547_s3, 1536, %s2903_s27, [#allocation3], %s2846_s13, %s2846_s13, %s2847_s14  }
  0x23   :  { %s2848_s26 = smov [#allocation7]   ;;  %s2794_s8 = scalar_lea.hbm %s3549_s5, 512 }
  0x24   :  { %s50_s28 = sshll.u32 %s2848_s26, 4  ;;  %p2795_p2 = scmp.ne.s32.totalorder %s3549_s5, %s2794_s8  ;;  %s51_s28 = int_to_ptr.vmem [resolvable:$true] %s50_s28 }
  0x25   :  { %p2798_p3 = scmp.lt.u32.totalorder %s2794_s8, %s3549_s5 }
  0x27   :  { %p2800_p4 = pnand %p2798_p3, %p2795_p2 }
  0x29   :  { %2803 = shalt.err (!%p2800_p4)
}
  0x2a   :  { %s2804_s15 = scalar_lea.vmem %s51_s28, 512  ;;  %p2809_p6 = scmp.lt.s32.totalorder %s51_s28, %s51_s28 }
  0x2b   :  { %p2805_p5 = scmp.ne.s32.totalorder %s51_s28, %s2804_s15  ;;  %p2810_p7 = scmp.lt.s32.totalorder %s2804_s15, %s2804_s15 }
  0x2d   :  { %p2811_p8 = por %p2810_p7, %p2809_p6 }
  0x2f   :  { %p2812_p9 = pnand %p2811_p8, %p2805_p5 }
  0x31   :  { %2815 = shalt.err (!%p2812_p9)
}
  0x32   :  { %56 = dma.hbm_to_vmem [thread:$0]  %s3549_s5, 512, %s51_s28, [#allocation6], %s2846_s13, %s2846_s13, %s2847_s14  }
  0x33   :  { %2838 = dma.done.wait [#allocation3], 1536  }
  0x34   :  { %2839 = vsyncadd [#allocation3], 4294965760 }
  0x35   :  { %2840 = dma.done.wait [#allocation6], 2048  }
  0x36   :  { %2841 = vsyncadd [#allocation6], 4294965248  ;;  %v2958_v0 = vld.sshfl [vmem:[%s3550_s6] sm:$0x33 pattern:$0x76325410] }
  0x37   :  { %v2963_v1 = vld [vmem:[%s3544_s0 + $0x8] sm:$0xff]  ;;  %v2967_v2 = vcombine.high %v2958_v0, %v2958_v0  ;;  %v2975_v3 = vld [vmem:[%s3544_s0] sm:$0xff]  ;;  %v2980_v4 = vld [vmem:[%s3544_s0 + $0x18] sm:$0xff]  ;;  %s2849_s8 = smov 2   ;;  %vm354_vm0 = vcmask 261120   ;;  %vm349_vm1 = vcmask 15360  }
  0x38   :  { %219 = vmatprep.mubr.f32.mxu0 %v2963_v1  ;;  %v2988_v5 = vld [vmem:[%s3544_s0 + $0x10] sm:$0xff]  ;;  %v2994_v6 = vld [vmem:[%s3544_s0 + $0x28] sm:$0xff]  ;;  %v3001_v7 = vld [vmem:[%s3544_s0 + $0x20] sm:$0xff]  ;;  %v241_v10 = vmul.f32 %v2963_v1, %v2963_v1  ;;  %v240_v11 = vmul.f32 %v2975_v3, %v2975_v3  ;;  %v243_v12 = vmul.f32 %v2980_v4, %v2980_v4  ;;  %v2850_v52 = vmov 0   ;;  %s2853_s17 = smov 126   ;;  %s2855_s18 = smov 1  }
  0x39   :  { %155 = vmatprep.subr.mxu0 %v2967_v2  ;;  %v3006_v8 = vld [vmem:[%s3544_s0 + $0x38] sm:$0xff]  ;;  %v3013_v9 = vld [vmem:[%s3544_s0 + $0x30] sm:$0xff]  ;;  %v242_v13 = vmul.f32 %v2988_v5, %v2988_v5  ;;  %v245_v14 = vmul.f32 %v2994_v6, %v2994_v6  ;;  %v244_v15 = vmul.f32 %v3001_v7, %v3001_v7  ;;  %v3033_v32 = vld [vmem:[#allocation7] sm:$0xff]  ;;  %2619 = vset.pattern.permute.xlu1 %v2850_v52  ;;  %vm556_vm2 = vcmask 1041408   ;;  %s2856_s19 = smov 127   ;;  %s2860_s13 = smov [#allocation8]  }
  0x3a   :  { %156 = vmatpush1.xpose.msra.mxu0 %v2958_v0  ;;  %v247_v16 = vmul.f32 %v3006_v8, %v3006_v8  ;;  %v246_v17 = vmul.f32 %v3013_v9, %v3013_v9  ;;  %v3042_v49 = vld [vmem:[#allocation7 + $0x8] sm:$0xff]  ;;  %v3044_v50 = vld [vmem:[#allocation7 + $0x10] sm:$0xff]  ;;  %v3050_v51 = vld [vmem:[#allocation7 + $0x18] sm:$0xff]  ;;  %2620 = vset.pattern.permute.xlu0 %v2850_v52  ;;  %s2318_s14 = sshll.u32 %s2860_s13, 4  ;;  %s2319_s14 = int_to_ptr.vmem [resolvable:$true] %s2318_s14 }
  0x3b   :  { %248 = vmatprep.subr.mxu0 %v2967_v2  ;;  %v3076_v61 = vld [vmem:[%s3546_s2] sm:$0xff]  ;;  %v3083_v62 = vld [vmem:[%s3546_s2 + $0x8] sm:$0xff]  ;;  %v3088_v63 = vld [vmem:[%s3546_s2 + $0x10] sm:$0xff]  ;;  %2336 = vmatprep.subr.msk.mxu1 %vm556_vm2, %v2967_v2  ;;  %s2816_s24 = scalar_lea.vmem %s2319_s14, 1024  ;;  %p2821_p11 = scmp.lt.s32.totalorder %s2319_s14, %s2319_s14 }
  0x3c   :  { %2337 = vmatpush1.msk.msra.mxu1 %vm556_vm2, %v2958_v0  ;;  %p2817_p10 = scmp.ne.s32.totalorder %s2319_s14, %s2816_s24  ;;  %p2822_p12 = scmp.lt.s32.totalorder %s2816_s24, %s2816_s24 }
  0x3d   :  { %220 = vmatmul.mubr.f32.vlgmr.msra.gmra.mrb[0].mxu0 %v2975_v3 }
  0x3e   :  { %224 = vmatprep.mubr.f32.mxu0 %v2980_v4  ;;  %249 = vmatpush1.xpose.msra.mxu0 %v2958_v0  ;;  %p2823_p13 = por %p2822_p12, %p2821_p11 }
  0x40   :  { %p2824_p0 = pnand %p2823_p13, %p2817_p10 }
  0x41   :  { %225 = vmatmul.mubr.f32.gmra.mrb[2].mxu0 %v2988_v5 }
  0x42   :  { %229 = vmatprep.mubr.f32.mxu0 %v2994_v6 }
  0x45   :  { %230 = vmatmul.mubr.f32.gmra.mrb[4].mxu0 %v3001_v7 }
  0x46   :  { %234 = vmatprep.mubr.f32.mxu0 %v3006_v8 }
  0x49   :  { %235 = vmatmul.mubr.f32.gmra.mrb[6].mxu0 %v3013_v9 }
  0x4a   :  { %312 = vmatprep.mubr.f32.mxu0 %v241_v10  ;;  %v3095_v10 = vld [vmem:[%s3546_s2 + $0x18] sm:$0xff] }
  0x4d   :  { %313 = vmatmul.mubr.f32.vlgmr.msra.gmra.mrb[8].mxu0 %v240_v11  ;;  %v2851_v11 = vmov 1  }
  0x4e   :  { %317 = vmatprep.mubr.f32.mxu0 %v243_v12  ;;  %v2852_v12 = vmov 0.0  }
  0x4f   :  { %625 = vmatprep.mubr.f32.mxu1 %v2852_v12 }
  0x51   :  { %318 = vmatmul.mubr.f32.gmra.mrb[10].mxu0 %v242_v13 }
  0x52   :  { %322 = vmatprep.mubr.f32.mxu0 %v245_v14 }
  0x55   :  { %323 = vmatmul.mubr.f32.gmra.mrb[12].mxu0 %v244_v15 }
  0x56   :  { %327 = vmatprep.mubr.f32.mxu0 %v247_v16 }
  0x59   :  { %328 = vmatmul.mubr.f32.gmra.mrb[14].mxu0 %v246_v17 }
  0x5a   :  { %2450 = vmatprep.mubr.msk.f32.mxu0 %vm354_vm0, %v3033_v32 }
 0x110   :  { %v221_v18 = vpop.f32.mrb[0].mxu0 }
 0x111   :  { %v223_v19 = vpop.f32.mrb[1].mxu0 }
 0x114   :  { %v226_v20 = vpop.f32.mrb[2].mxu0 }
 0x115   :  { %v228_v21 = vpop.f32.mrb[3].mxu0 }
 0x118   :  { %v231_v22 = vpop.f32.mrb[4].mxu0 }
 0x119   :  { %v233_v23 = vpop.f32.mrb[5].mxu0 }
 0x11c   :  { %v236_v24 = vpop.f32.mrb[6].mxu0 }
 0x11d   :  { %v238_v25 = vpop.f32.mrb[7].mxu0 }
 0x120   :  { %v314_v26 = vpop.f32.mrb[8].mxu0 }
 0x121   :  { %v316_v27 = vpop.f32.mrb[9].mxu0 }
 0x124   :  { %v319_v28 = vpop.f32.mrb[10].mxu0 }
 0x125   :  { %v2609_v29 = vpack.i.bf16 %v319_v28, %v314_v26  ;;  %v321_v30 = vpop.f32.mrb[11].mxu0 }
 0x127   :  { %2610 = vrot.lane.b32.xlu0 %v2609_v29, %s2849_s8 }
 0x128   :  { %v324_v31 = vpop.f32.mrb[12].mxu0 }
 0x129   :  { %v326_v33 = vpop.f32.mrb[13].mxu0 }
 0x12c   :  { %v329_v34 = vpop.f32.mrb[14].mxu0 }
 0x12d   :  { %v2614_v35 = vpack.i.bf16 %v329_v34, %v324_v31  ;;  %v331_v36 = vpop.f32.mrb[15].mxu0 }
 0x12f   :  { %2615 = vrot.lane.b32.xlu0 %v2614_v35, %s2849_s8 }
 0x199   :  { %v2611_v37 = vpop.permute.xlu0 %2610 }
 0x19a   :  { %v2613_v38 = vunpack.i.h.bf16 %v2611_v37  ;;  %v2612_v39 = vunpack.i.l.bf16 %v2611_v37 }
 0x19c   :  { %v350_v40 = vsel %vm349_vm1, %v221_v18, %v2612_v39  ;;  %v351_v41 = vsel %vm349_vm1, %v226_v20, %v2613_v38 }
 0x19d   :  { %v2470_v42 = vpack.c.bf16 %v351_v41, %v350_v40 }
 0x19f   :  { %2471 = vmatprep.subr.bf16.mxu0 %v2470_v42 }
 0x1a0   :  { %2473 = vmatpush3.bf16.msra.mxu0 %v2470_v42 }
 0x1a1   :  { %v2616_v43 = vpop.permute.xlu0 %2615 }
 0x1a2   :  { %v2618_v44 = vunpack.i.h.bf16 %v2616_v43  ;;  %v2617_v45 = vunpack.i.l.bf16 %v2616_v43 }
 0x1a4   :  { %v352_v46 = vsel %vm349_vm1, %v231_v22, %v2617_v45  ;;  %v353_v47 = vsel %vm349_vm1, %v236_v24, %v2618_v44 }
 0x1a5   :  { %v2474_v48 = vpack.c.bf16 %v353_v47, %v352_v46 }
 0x1a7   :  { %2475 = vmatprep.subr.bf16.mxu0 %v2474_v48 }
 0x1a8   :  { %2477 = vmatpush3.bf16.msra.mxu0 %v2474_v48 }
 0x1a9   :  { %2342 = vmatprep.subr.msk.mxu0 %vm556_vm2, %v2967_v2 }
 0x1ab   :  { %2451 = vmatmul.mubr.msk.f32.vlgmr.msra.gmra.mrb[16].mxu0 %vm354_vm0, %v3042_v49 }
 0x1ac   :  { %2453 = vmatprep.mubr.msk.f32.mxu0 %vm354_vm0, %v3044_v50  ;;  %2343 = vmatpush1.msk.msra.mxu0 %vm556_vm2, %v2958_v0 }
 0x1ad   :  { %1283 = vmatprep.subr.mxu0 %v2967_v2 }
 0x1af   :  { %2454 = vmatmul.mubr.msk.f32.gmra.mrb[18].mxu0 %vm354_vm0, %v3050_v51 }
 0x1b0   :  { %734 = vmatprep.mubr.f32.mxu0 %v2852_v12 }
 0x27e   :  { %v3054_v53 = vpop.f32.mrb[16].mxu0 }
 0x27f   :  { %v3056_v54 = vpop.f32.mrb[17].mxu0  ;;  %v453_v58 = vmul.f32 %v3054_v53, %v3054_v53 }
 0x280   :  { %v452_v55 = vmul.f32 %v3056_v54, %v3056_v54 }
 0x282   :  { %460 = vrot.lane.b32.xlu1 %v452_v55, %s2849_s8  ;;  %v3061_v56 = vpop.f32.mrb[18].mxu0 }
 0x283   :  { %v3063_v57 = vpop.f32.mrb[19].mxu0  ;;  %v455_v60 = vmul.f32 %v3061_v56, %v3061_v56 }
 0x284   :  { %v454_v59 = vmul.f32 %v3063_v57, %v3063_v57 }
 0x286   :  { %462 = vrot.lane.b32.xlu1 %v453_v58, %s2849_s8  ;;  %464 = vrot.lane.b32.xlu0 %v454_v59, %s2849_s8 }
 0x28a   :  { %489 = vperm.xlu1 %2619, %v3076_v61   ;;  %466 = vrot.lane.b32.xlu0 %v455_v60, %s2849_s8 }
 0x28e   :  { %493 = vperm.xlu1 %2619, %v3083_v62   ;;  %497 = vperm.xlu0 %2620, %v3088_v63  }
 0x292   :  { %501 = vperm.xlu1 %2619, %v3095_v10   ;;  %2622 = vset.pattern.permute.xlu0 %v2851_v11 }
 0x293   :  { %533 = vperm.xlu0 %2622, %v3083_v62  }
 0x296   :  { %2621 = vset.pattern.permute.xlu1 %v2851_v11 }
 0x297   :  { %529 = vperm.xlu1 %2621, %v3076_v61  }
 0x2f4   :  { %v461_v13 = vpop.permute.xlu1 %460 }
 0x2f5   :  { %v472_v14 = vsub.f32 %v3056_v54, %v461_v13 }
 0x2f7   :  { %v476_v15 = vmax.f32 %v472_v14, 0.0  ;;  %v2854_v14 = vmov 2  }
 0x2f8   :  { %v463_v16 = vpop.permute.xlu1 %462  ;;  %v465_v17 = vpop.permute.xlu0 %464  ;;  %2663 = vset.pattern.permute.xlu0 %v2854_v14 }
 0x2f9   :  { %v473_v18 = vsub.f32 %v3054_v53, %v463_v16  ;;  %v480_v19 = vadd.f32 1e-05, %v476_v15  ;;  %v474_v21 = vsub.f32 %v3063_v57, %v465_v17 }
 0x2fb   :  { %v477_v20 = vmax.f32 %v473_v18, 0.0  ;;  %2721 = vrsqrt.f32 %v480_v19  ;;  %v478_v24 = vmax.f32 %v474_v21, 0.0 }
 0x2fc   :  { %v467_v22 = vpop.permute.xlu0 %466 }
 0x2fd   :  { %v481_v23 = vadd.f32 1e-05, %v477_v20  ;;  %v475_v25 = vsub.f32 %v3061_v56, %v467_v22  ;;  %v482_v26 = vadd.f32 1e-05, %v478_v24 }
 0x2ff   :  { %2723 = vrsqrt.f32 %v481_v23  ;;  %v479_v27 = vmax.f32 %v475_v25, 0.0 }
 0x300   :  { %2725 = vrsqrt.f32 %v482_v26 }
 0x301   :  { %v483_v28 = vadd.f32 1e-05, %v479_v27 }
 0x303   :  { %2727 = vrsqrt.f32 %v483_v28 }
 0x305   :  { %v2722_v29 = vpop.eup %2721 }
 0x309   :  { %v490_v30 = vpop.permute.xlu1 %489  ;;  %v2724_v33 = vpop.eup %2723 }
 0x30a   :  { %v504_v31 = vmul.f32 %v2722_v29, %v490_v30  ;;  %v2726_v37 = vpop.eup %2725 }
 0x30c   :  { %512 = vrot.lane.b32.xlu1 %v504_v31, %s2853_s17 }
 0x30d   :  { %v494_v34 = vpop.permute.xlu1 %493  ;;  %v498_v36 = vpop.permute.xlu0 %497 }
 0x30e   :  { %v505_v35 = vmul.f32 %v2724_v33, %v494_v34  ;;  %v506_v38 = vmul.f32 %v2726_v37, %v498_v36  ;;  %v2728_v40 = vpop.eup %2727 }
 0x310   :  { %537 = vperm.xlu1 %2621, %v3088_v63   ;;  %514 = vrot.lane.b32.xlu0 %v505_v35, %s2853_s17 }
 0x311   :  { %v502_v39 = vpop.permute.xlu1 %501 }
 0x312   :  { %v507_v41 = vmul.f32 %v2728_v40, %v502_v39  ;;  %v534_v43 = vpop.permute.xlu0 %533 }
 0x314   :  { %541 = vperm.xlu1 %2621, %v3095_v10   ;;  %516 = vrot.lane.b32.xlu0 %v506_v38, %s2853_s17 }
 0x316   :  { %v530_v42 = vpop.permute.xlu1 %529 }
 0x318   :  { %518 = vrot.lane.b32.xlu1 %v507_v41, %s2853_s17 }
 0x319   :  { %2664 = vset.pattern.permute.xlu1 %v2854_v14  ;;  %v89_v14 = vlaneseq }
 0x37e   :  { %v513_v44 = vpop.permute.xlu1 %512 }
 0x37f   :  { %v524_v45 = vmul.f32 %v513_v44, %v3056_v54  ;;  %2338 = vmatmul.mubr.msk.f32.vlgmr.msra.gmra.mrb[0].mxu1 %vm349_vm1, %v513_v44 }
 0x380   :  { %631 = vmatprep.mubr.f32.mxu1 %v2852_v12 }
 0x381   :  { %v544_v46 = vsub.f32 %v530_v42, %v524_v45 }
 0x382   :  { %v515_v47 = vpop.permute.xlu0 %514 }
 0x383   :  { %v525_v48 = vmul.f32 %v3054_v53, %v515_v47  ;;  %2339 = vmatmul.mubr.msk.f32.gmra.mrb[2].mxu1 %vm349_vm1, %v515_v47  ;;  %2344 = vmatmul.mubr.msk.f32.vlgmr.msra.gmra.mrb[20].mxu0 %vm349_vm1, %v544_v46 }
 0x384   :  { %637 = vmatprep.mubr.f32.mxu1 %v2852_v12  ;;  %740 = vmatprep.mubr.f32.mxu0 %v2852_v12 }
 0x385   :  { %v545_v52 = vsub.f32 %v534_v43, %v525_v48  ;;  %1284 = vmatpush1.xpose.msra.mxu0 %v2958_v0 }
 0x386   :  { %v517_v54 = vpop.permute.xlu0 %516  ;;  %1376 = vmatprep.subr.mxu0 %v2967_v2 }
 0x387   :  { %2340 = vmatmul.mubr.msk.f32.gmra.mrb[4].mxu1 %vm349_vm1, %v517_v54  ;;  %2345 = vmatmul.mubr.msk.f32.gmra.mrb[22].mxu0 %vm349_vm1, %v545_v52  ;;  %v526_v53 = vmul.f32 %v517_v54, %v3063_v57 }
 0x388   :  { %746 = vmatprep.mubr.f32.mxu0 %v2852_v12  ;;  %643 = vmatprep.mubr.f32.mxu1 %v2852_v12 }
 0x38f   :  { %v538_v55 = vpop.permute.xlu1 %537 }
 0x390   :  { %v546_v58 = vsub.f32 %v538_v55, %v526_v53 }
 0x392   :  { %2346 = vmatmul.mubr.msk.f32.gmra.mrb[24].mxu0 %vm349_vm1, %v546_v58 }
 0x393   :  { %v542_v59 = vpop.permute.xlu1 %541  ;;  %752 = vmatprep.mubr.f32.mxu0 %v2852_v12 }
 0x397   :  { %v519_v60 = vpop.permute.xlu1 %518 }
 0x398   :  { %v527_v11 = vmul.f32 %v3061_v56, %v519_v60  ;;  %2341 = vmatmul.mubr.msk.f32.gmra.mrb[6].mxu1 %vm349_vm1, %v519_v60 }
 0x399   :  { %934 = vmatprep.mubr.f32.mxu1 %v2852_v12 }
 0x39a   :  { %v547_v13 = vsub.f32 %v542_v59, %v527_v11  ;;  %v856_v11 = vld [vmem:[#allocation2 + $0x30] sm:$0xff] }
 0x39c   :  { %2347 = vmatmul.mubr.msk.f32.gmra.mrb[26].mxu0 %vm349_vm1, %v547_v13  ;;  %v857_v13 = vld [vmem:[#allocation2 + $0x38] sm:$0xff] }
 0x452   :  { %v627_v57 = vpop.f32.mrb[0].mxu1 }
 0x453   :  { %v629_v15 = vpop.f32.mrb[1].mxu1  ;;  %v650_v16 = vmul.f32 %v627_v57, %v2975_v3  ;;  %v3170_v57 = vand.u32 127, %v89_v14 }
 0x454   :  { %v651_v17 = vmul.f32 %v629_v15, %v2963_v1 }
 0x455   :  { %v91_v15 = vadd.s32 128, %v3170_v57  ;;  %vm791_vm3 = vcmp.lt.s32.totalorder %v3170_v57, 1  ;;  %vm116_vm5 = vcmp.ne.s32.totalorder %v3170_v57, 0  ;;  %vm828_vm8 = vcmp.lt.s32.totalorder %v3170_v57, 127 }
 0x456   :  { %v633_v18 = vpop.f32.mrb[2].mxu1  ;;  %v736_v19 = vpop.f32.mrb[20].mxu0  ;;  %vm3187_vm7 = vmpackc.low %vm116_vm5, %vm116_vm5  ;;  %vm118_vm10 = vcmp.ne.s32.totalorder %v3170_v57, 127  ;;  %v1950_v57 = vld [vmem:[#allocation5 + $0x10] sm:$0xff] }
 0x457   :  { %v759_v20 = vadd.f32 %v736_v19, %v650_v16  ;;  %v635_v56 = vpop.f32.mrb[3].mxu1  ;;  %v738_v21 = vpop.f32.mrb[21].mxu0  ;;  %v652_v23 = vmul.f32 %v633_v18, %v2988_v5  ;;  %v103_v16 = vand.u32 127, %v91_v15  ;;  %vm3228_vm12 = vmpackc.low %vm118_vm10, %vm118_vm10 }
 0x458   :  { %v760_v22 = vadd.f32 %v738_v21, %v651_v17  ;;  %v653_v24 = vmul.f32 %v635_v56, %v2980_v4 }
 0x459   :  { %v767_v31 = vmax.f32 %v759_v20, 0.0  ;;  %vm117_vm4 = vcmp.ne.s32.totalorder %v103_v16, 0  ;;  %vm3196_vm9 = vcmp.ne.s32.totalorder %v103_v16, 127 }
 0x45a   :  { %v639_v25 = vpop.f32.mrb[4].mxu1  ;;  %v742_v26 = vpop.f32.mrb[22].mxu0  ;;  %v768_v33 = vmax.f32 %v760_v22, 0.0  ;;  %vm3183_vm6 = vmpackc.low %vm117_vm4, %vm117_vm4 }
 0x45b   :  { %v761_v27 = vadd.f32 %v742_v26, %v652_v23  ;;  %v641_v28 = vpop.f32.mrb[5].mxu1  ;;  %v744_v29 = vpop.f32.mrb[23].mxu0  ;;  %v654_v4 = vmul.f32 %v639_v25, %v3001_v7  ;;  %vm3224_vm11 = vmpackc.low %vm3196_vm9, %vm3196_vm9 }
 0x45c   :  { %v762_v30 = vadd.f32 %v744_v29, %v653_v24  ;;  %v655_v5 = vmul.f32 %v641_v28, %v2994_v6 }
 0x45d   :  { %v769_v3 = vmax.f32 %v761_v27, 0.0 }
 0x45e   :  { %v770_v1 = vmax.f32 %v762_v30, 0.0 }
 0x45f   :  { %v2480_v34 = vpack.c.bf16 %v769_v3, %v767_v31  ;;  %v2623_v35 = vpack.i.bf16 %v769_v3, %v767_v31 }
 0x460   :  { %v2628_v36 = vpack.i.bf16 %v770_v1, %v768_v33  ;;  %v2478_v37 = vpack.c.bf16 %v770_v1, %v768_v33 }
 0x461   :  { %2624 = vrot.lane.b32.xlu0 %v2623_v35, %s2855_s18 }
 0x462   :  { %2629 = vrot.lane.b32.xlu1 %v2628_v36, %s2855_s18  ;;  %2479 = vmatprep.subr.bf16.mxu1 %v2478_v37 }
 0x463   :  { %2481 = vmatpush1.bf16.msra.mxu1 %v2480_v34 }
 0x465   :  { %v748_v38 = vpop.f32.mrb[24].mxu0 }
 0x466   :  { %v763_v39 = vadd.f32 %v748_v38, %v654_v4  ;;  %v750_v40 = vpop.f32.mrb[25].mxu0 }
 0x467   :  { %v764_v41 = vadd.f32 %v750_v40, %v655_v5 }
 0x468   :  { %v771_v54 = vmax.f32 %v763_v39, 0.0 }
 0x469   :  { %v772_v55 = vmax.f32 %v764_v41, 0.0 }
 0x46b   :  { %v645_v42 = vpop.f32.mrb[6].mxu1 }
 0x46c   :  { %v647_v43 = vpop.f32.mrb[7].mxu1  ;;  %v656_v44 = vmul.f32 %v645_v42, %v3013_v9  ;;  %v854_v9 = vld [vmem:[#allocation2 + $0x20] sm:$0xff] }
 0x46d   :  { %v657_v45 = vmul.f32 %v647_v43, %v3006_v8  ;;  %v855_v8 = vld [vmem:[#allocation2 + $0x28] sm:$0xff] }
 0x46f   :  { %v754_v46 = vpop.f32.mrb[26].mxu0 }
 0x470   :  { %v765_v47 = vadd.f32 %v754_v46, %v656_v44  ;;  %v756_v48 = vpop.f32.mrb[27].mxu0 }
 0x471   :  { %v766_v52 = vadd.f32 %v756_v48, %v657_v45 }
 0x472   :  { %v773_v53 = vmax.f32 %v765_v47, 0.0 }
 0x473   :  { %v774_v7 = vmax.f32 %v766_v52, 0.0 }
 0x474   :  { %v2484_v58 = vpack.c.bf16 %v773_v53, %v771_v54  ;;  %v2633_v6 = vpack.i.bf16 %v773_v53, %v771_v54  ;;  %v849_v53 = vld [vmem:[#allocation2] sm:$0xff] }
 0x475   :  { %v2638_v59 = vpack.i.bf16 %v774_v7, %v772_v55  ;;  %v2482_v60 = vpack.c.bf16 %v774_v7, %v772_v55  ;;  %v2161_v55 = vld [vmem:[#allocation5 + $0x48] sm:$0xff] }
 0x476   :  { %2634 = vrot.lane.b32.xlu0 %v2633_v6, %s2855_s18 }
 0x477   :  { %2639 = vrot.lane.b32.xlu1 %v2638_v59, %s2855_s18  ;;  %2483 = vmatprep.subr.bf16.mxu1 %v2482_v60 }
 0x478   :  { %2485 = vmatpush1.bf16.msra.mxu1 %v2484_v58 }
 0x47a   :  { %2644 = vrot.lane.b32.xlu0 %v2623_v35, %s2856_s19  ;;  %v87_v35 = vld [vmem:[%s3545_s1 + $0x18] sm:$0xff] }
 0x47b   :  { %2649 = vrot.lane.b32.xlu1 %v2628_v36, %s2856_s19  ;;  %2348 = vmatmul.mubr.msk.f32.vlgmr.msra.gmra.mrb[8].mxu1 %vm354_vm0, %v854_v9  ;;  %v2162_v9 = vld [vmem:[#allocation5 + $0x50] sm:$0xff] }
 0x47c   :  { %940 = vmatprep.mubr.f32.mxu1 %v2852_v12 }
 0x47e   :  { %2654 = vrot.lane.b32.xlu0 %v2633_v6, %s2856_s19 }
 0x47f   :  { %2659 = vrot.lane.b32.xlu1 %v2638_v59, %s2856_s19  ;;  %2349 = vmatmul.mubr.msk.f32.gmra.mrb[10].mxu1 %vm354_vm0, %v855_v8 }
 0x480   :  { %946 = vmatprep.mubr.f32.mxu1 %v2852_v12 }
 0x482   :  { %122 = vperm.xlu0 %2663, %v3076_v61  }
 0x483   :  { %127 = vperm.xlu1 %2664, %v3083_v62   ;;  %2350 = vmatmul.mubr.msk.f32.gmra.mrb[12].mxu1 %vm354_vm0, %v856_v11 }
 0x484   :  { %952 = vmatprep.mubr.f32.mxu1 %v2852_v12 }
 0x486   :  { %137 = vperm.xlu0 %2663, %v3095_v10  }
 0x487   :  { %132 = vperm.xlu1 %2664, %v3088_v63   ;;  %2351 = vmatmul.mubr.msk.f32.gmra.mrb[14].mxu1 %vm354_vm0, %v857_v13 }
 0x488   :  { %1035 = vmatprep.mubr.f32.mxu1 %v2852_v12 }
 0x4d3   :  { %v2625_v17 = vpop.permute.xlu0 %2624 }
 0x4d4   :  { %v2627_v18 = vunpack.i.h.bf16 %v2625_v17  ;;  %v2626_v19 = vunpack.i.l.bf16 %v2625_v17  ;;  %v2630_v20 = vpop.permute.xlu1 %2629  ;;  %v850_v17 = vld [vmem:[#allocation2 + $0x8] sm:$0xff] }
 0x4d5   :  { %v2632_v56 = vunpack.i.h.bf16 %v2630_v20  ;;  %v2631_v21 = vunpack.i.l.bf16 %v2630_v20  ;;  %v851_v20 = vld [vmem:[#allocation2 + $0x10] sm:$0xff] }
 0x4d7   :  { %v792_v22 = vsel %vm791_vm3, %v2626_v19, %v2631_v21  ;;  %v793_v23 = vsel %vm791_vm3, %v2627_v18, %v2632_v56  ;;  %v796_v24 = vsel %vm791_vm3, %v2631_v21, %v2626_v19  ;;  %v797_v25 = vsel %vm791_vm3, %v2632_v56, %v2627_v18  ;;  %v852_v56 = vld [vmem:[#allocation2 + $0x18] sm:$0xff]  ;;  %v1061_v21 = vld [vmem:[#allocation2 + $0x40] sm:$0xff] }
 0x4d8   :  { %v2486_v27 = vpack.c.bf16 %v793_v23, %v792_v22  ;;  %v2489_v28 = vpack.c.bf16 %v797_v25, %v796_v24  ;;  %v1062_v22 = vld [vmem:[#allocation2 + $0x48] sm:$0xff]  ;;  %v1063_v23 = vld [vmem:[#allocation2 + $0x50] sm:$0xff]  ;;  %v84_v24 = vld [vmem:[%s3545_s1] sm:$0xff] }
 0x4d9   :  { %v1064_v25 = vld [vmem:[#allocation2 + $0x58] sm:$0xff] }
 0x4da   :  { %2488 = vmatprep.subr.msk.bf16.mxu1 %vm3183_vm6, %v2486_v27 }
 0x4db   :  { %2491 = vmatpush1.bf16.msk.msra.mxu1 %vm3187_vm7, %v2489_v28 }
 0x4e8   :  { %v2635_v30 = vpop.permute.xlu0 %2634 }
 0x4e9   :  { %v2637_v31 = vunpack.i.h.bf16 %v2635_v30  ;;  %v2636_v3 = vunpack.i.l.bf16 %v2635_v30  ;;  %v2640_v33 = vpop.permute.xlu1 %2639  ;;  %v85_v30 = vld [vmem:[%s3545_s1 + $0x8] sm:$0xff] }
 0x4ea   :  { %v2642_v1 = vunpack.i.h.bf16 %v2640_v33  ;;  %v2641_v34 = vunpack.i.l.bf16 %v2640_v33  ;;  %v86_v33 = vld [vmem:[%s3545_s1 + $0x10] sm:$0xff] }
 0x4ec   :  { %v794_v36 = vsel %vm791_vm3, %v2636_v3, %v2641_v34  ;;  %v795_v37 = vsel %vm791_vm3, %v2637_v31, %v2642_v1  ;;  %v798_v4 = vsel %vm791_vm3, %v2641_v34, %v2636_v3  ;;  %v799_v5 = vsel %vm791_vm3, %v2642_v1, %v2637_v31  ;;  %v2645_v38 = vpop.permute.xlu0 %2644 }
 0x4ed   :  { %v2492_v39 = vpack.c.bf16 %v795_v37, %v794_v36  ;;  %v2495_v40 = vpack.c.bf16 %v799_v5, %v798_v4  ;;  %v2647_v41 = vunpack.i.h.bf16 %v2645_v38  ;;  %v2646_v42 = vunpack.i.l.bf16 %v2645_v38  ;;  %v2650_v43 = vpop.permute.xlu1 %2649 }
 0x4ee   :  { %v2652_v44 = vunpack.i.h.bf16 %v2650_v43  ;;  %v2651_v45 = vunpack.i.l.bf16 %v2650_v43 }
 0x4ef   :  { %2494 = vmatprep.subr.msk.bf16.mxu1 %vm3183_vm6, %v2492_v39 }
 0x4f0   :  { %v829_v46 = vsel %vm828_vm8, %v2646_v42, %v2651_v45  ;;  %v830_v47 = vsel %vm828_vm8, %v2647_v41, %v2652_v44  ;;  %v833_v48 = vsel %vm828_vm8, %v2651_v45, %v2646_v42  ;;  %v834_v52 = vsel %vm828_vm8, %v2652_v44, %v2647_v41  ;;  %v2655_v54 = vpop.permute.xlu0 %2654  ;;  %2497 = vmatpush1.bf16.msk.msra.mxu1 %vm3187_vm7, %v2495_v40 }
 0x4f1   :  { %v2498_v7 = vpack.c.bf16 %v834_v52, %v833_v48  ;;  %v2501_v58 = vpack.c.bf16 %v830_v47, %v829_v46  ;;  %v2657_v6 = vunpack.i.h.bf16 %v2655_v54  ;;  %v2656_v59 = vunpack.i.l.bf16 %v2655_v54  ;;  %v2660_v60 = vpop.permute.xlu1 %2659 }
 0x4f2   :  { %v2662_v8 = vunpack.i.h.bf16 %v2660_v60  ;;  %v2661_v11 = vunpack.i.l.bf16 %v2660_v60 }
 0x4f3   :  { %2360 = vmatmul.mubr.msk.f32.vlgmr.msra.gmra.mrb[8].mxu1 %vm354_vm0, %v849_v53  ;;  %2500 = vmatprep.subr.msk.bf16.mxu1 %vm3224_vm11, %v2498_v7 }
 0x4f4   :  { %v831_v13 = vsel %vm828_vm8, %v2656_v59, %v2661_v11  ;;  %v832_v14 = vsel %vm828_vm8, %v2657_v6, %v2662_v8  ;;  %v835_v15 = vsel %vm828_vm8, %v2661_v11, %v2656_v59  ;;  %v836_v16 = vsel %vm828_vm8, %v2662_v8, %v2657_v6  ;;  %2503 = vmatpush1.bf16.msk.msra.mxu1 %vm3228_vm12, %v2501_v58 }
 0x4f5   :  { %v2504_v18 = vpack.c.bf16 %v836_v16, %v835_v15  ;;  %v2507_v19 = vpack.c.bf16 %v832_v14, %v831_v13  ;;  %1041 = vmatprep.mubr.f32.mxu1 %v2852_v12 }
 0x4f7   :  { %2361 = vmatmul.mubr.msk.f32.gmra.mrb[10].mxu1 %vm354_vm0, %v850_v17  ;;  %2506 = vmatprep.subr.msk.bf16.mxu1 %vm3224_vm11, %v2504_v18 }
 0x4f8   :  { %2509 = vmatpush1.bf16.msk.msra.mxu1 %vm3228_vm12, %v2507_v19  ;;  %1047 = vmatprep.mubr.f32.mxu1 %v2852_v12 }
 0x4f9   :  { %2376 = vmatprep.subr.msk.mxu1 %vm556_vm2, %v2967_v2 }
 0x4fb   :  { %2362 = vmatmul.mubr.msk.f32.gmra.mrb[12].mxu1 %vm354_vm0, %v851_v20 }
 0x4fc   :  { %1053 = vmatprep.mubr.f32.mxu1 %v2852_v12 }
 0x4ff   :  { %2363 = vmatmul.mubr.msk.f32.gmra.mrb[14].mxu1 %vm354_vm0, %v852_v56 }
 0x500   :  { %1141 = vmatprep.mubr.f32.mxu1 %v2852_v12 }
 0x501   :  { %v123_v27 = vpop.permute.xlu0 %122 }
 0x502   :  { %v140_v28 = vadd.f32 %v123_v27, %v84_v24  ;;  %v128_v31 = vpop.permute.xlu1 %127 }
 0x503   :  { %2372 = vmatmul.mubr.msk.f32.vlgmr.msra.gmra.mrb[8].mxu1 %vm354_vm0, %v1061_v21  ;;  %v141_v3 = vadd.f32 %v128_v31, %v85_v30 }
 0x504   :  { %1147 = vmatprep.mubr.f32.mxu1 %v2852_v12  ;;  %2377 = vmatpush1.msk.msra.mxu1 %vm556_vm2, %v2958_v0 }
 0x505   :  { %v138_v36 = vpop.permute.xlu0 %137 }
 0x506   :  { %v133_v1 = vpop.permute.xlu1 %132  ;;  %v143_v37 = vadd.f32 %v138_v36, %v87_v35  ;;  %v2857_v35 = vmov 3  }
 0x507   :  { %2373 = vmatmul.mubr.msk.f32.gmra.mrb[10].mxu1 %vm354_vm0, %v1062_v22  ;;  %v142_v34 = vadd.f32 %v133_v1, %v86_v33  ;;  %2675 = vset.pattern.permute.xlu0 %v2857_v35 }
 0x508   :  { %1153 = vmatprep.mubr.f32.mxu1 %v2852_v12  ;;  %2676 = vset.pattern.permute.xlu1 %v2857_v35 }
 0x50b   :  { %2374 = vmatmul.mubr.msk.f32.gmra.mrb[12].mxu1 %vm354_vm0, %v1063_v23 }
 0x50c   :  { %1159 = vmatprep.mubr.f32.mxu1 %v2852_v12 }
 0x50f   :  { %2375 = vmatmul.mubr.msk.f32.gmra.mrb[14].mxu1 %vm354_vm0, %v1064_v25 }
 0x510   :  { %1250 = vmatprep.mubr.f32.mxu1 %v2852_v12 }
 0x513   :  { %2378 = vmatmul.mubr.msk.f32.vlgmr.msra.gmra.mrb[8].mxu1 %vm349_vm1, %v140_v28 }
 0x514   :  { %1256 = vmatprep.mubr.f32.mxu1 %v2852_v12 }
 0x517   :  { %2379 = vmatmul.mubr.msk.f32.gmra.mrb[10].mxu1 %vm349_vm1, %v141_v3 }
 0x518   :  { %1262 = vmatprep.mubr.f32.mxu1 %v2852_v12 }
 0x51b   :  { %2380 = vmatmul.mubr.msk.f32.gmra.mrb[12].mxu1 %vm349_vm1, %v142_v34 }
 0x51c   :  { %1268 = vmatprep.mubr.f32.mxu1 %v2852_v12 }
 0x51f   :  { %2381 = vmatmul.mubr.msk.f32.gmra.mrb[14].mxu1 %vm349_vm1, %v143_v37 }
 0x520   :  { %2033 = vmatprep.mubr.f32.mxu1 %v2852_v12 }
 0x5e6   :  { %v3288_v4 = vpop.f32.mrb[8].mxu1 }
 0x5e7   :  { %v3290_v5 = vpop.f32.mrb[9].mxu1  ;;  %v1368_v45 = vmul.f32 %v3288_v4, %v3288_v4 }
 0x5e8   :  { %1347 = vmatprep.mubr.f32.mxu0 %v3290_v5  ;;  %v1369_v44 = vmul.f32 %v3290_v5, %v3290_v5 }
 0x5e9   :  { %1348 = vmatmul.mubr.f32.vlgmr.msra.gmra.mrb[28].mxu0 %v3288_v4 }
 0x5ea   :  { %v3294_v38 = vpop.f32.mrb[10].mxu1  ;;  %1377 = vmatpush1.xpose.msra.mxu0 %v2958_v0 }
 0x5eb   :  { %v3297_v39 = vpop.f32.mrb[11].mxu1  ;;  %v1370_v47 = vmul.f32 %v3294_v38, %v3294_v38 }
 0x5ec   :  { %1352 = vmatprep.mubr.f32.mxu0 %v3297_v39  ;;  %v1371_v46 = vmul.f32 %v3297_v39, %v3297_v39 }
 0x5ed   :  { %1353 = vmatmul.mubr.f32.gmra.mrb[30].mxu0 %v3294_v38 }
 0x5ee   :  { %v3301_v40 = vpop.f32.mrb[12].mxu1 }
 0x5ef   :  { %v3303_v41 = vpop.f32.mrb[13].mxu1  ;;  %v1372_v52 = vmul.f32 %v3301_v40, %v3301_v40 }
 0x5f0   :  { %1357 = vmatprep.mubr.f32.mxu0 %v3303_v41  ;;  %v1373_v48 = vmul.f32 %v3303_v41, %v3303_v41 }
 0x5f1   :  { %1358 = vmatmul.mubr.f32.gmra.mrb[32].mxu0 %v3301_v40 }
 0x5f2   :  { %v3307_v42 = vpop.f32.mrb[14].mxu1 }
 0x5f3   :  { %v3309_v43 = vpop.f32.mrb[15].mxu1  ;;  %v1374_v53 = vmul.f32 %v3307_v42, %v3307_v42 }
 0x5f4   :  { %1362 = vmatprep.mubr.f32.mxu0 %v3309_v43  ;;  %v1375_v54 = vmul.f32 %v3309_v43, %v3309_v43 }
 0x5f5   :  { %1363 = vmatmul.mubr.f32.gmra.mrb[34].mxu0 %v3307_v42 }
 0x5f6   :  { %1440 = vmatprep.mubr.f32.mxu0 %v1369_v44 }
 0x5f9   :  { %1441 = vmatmul.mubr.f32.vlgmr.msra.gmra.mrb[36].mxu0 %v1368_v45  ;;  %v2858_v45 = vmov 4  }
 0x5fa   :  { %1445 = vmatprep.mubr.f32.mxu0 %v1371_v46 }
 0x5fd   :  { %1446 = vmatmul.mubr.f32.gmra.mrb[38].mxu0 %v1370_v47 }
 0x5fe   :  { %1450 = vmatprep.mubr.f32.mxu0 %v1373_v48 }
 0x601   :  { %1451 = vmatmul.mubr.f32.gmra.mrb[40].mxu0 %v1372_v52 }
 0x602   :  { %1455 = vmatprep.mubr.f32.mxu0 %v1375_v54 }
 0x605   :  { %1456 = vmatmul.mubr.f32.gmra.mrb[42].mxu0 %v1374_v53 }
 0x606   :  { %2464 = vmatprep.mubr.msk.f32.mxu0 %vm354_vm0, %v3033_v32 }
 0x6bc   :  { %v1349_v7 = vpop.f32.mrb[28].mxu0 }
 0x6bd   :  { %v1351_v58 = vpop.f32.mrb[29].mxu0 }
 0x6c0   :  { %v1354_v6 = vpop.f32.mrb[30].mxu0 }
 0x6c1   :  { %v1356_v59 = vpop.f32.mrb[31].mxu0 }
 0x6c4   :  { %v1359_v60 = vpop.f32.mrb[32].mxu0 }
 0x6c5   :  { %v1361_v8 = vpop.f32.mrb[33].mxu0 }
 0x6c8   :  { %v1364_v11 = vpop.f32.mrb[34].mxu0 }
 0x6c9   :  { %v1366_v13 = vpop.f32.mrb[35].mxu0 }
 0x6cc   :  { %v1442_v14 = vpop.f32.mrb[36].mxu0 }
 0x6cd   :  { %v1444_v15 = vpop.f32.mrb[37].mxu0 }
 0x6d0   :  { %v1447_v16 = vpop.f32.mrb[38].mxu0 }
 0x6d1   :  { %v2665_v17 = vpack.i.bf16 %v1447_v16, %v1442_v14  ;;  %v1449_v18 = vpop.f32.mrb[39].mxu0 }
 0x6d3   :  { %2666 = vrot.lane.b32.xlu1 %v2665_v17, %s2849_s8 }
 0x6d4   :  { %v1452_v19 = vpop.f32.mrb[40].mxu0 }
 0x6d5   :  { %v1454_v20 = vpop.f32.mrb[41].mxu0 }
 0x6d8   :  { %v1457_v56 = vpop.f32.mrb[42].mxu0 }
 0x6d9   :  { %v2670_v21 = vpack.i.bf16 %v1457_v56, %v1452_v19  ;;  %v1459_v32 = vpop.f32.mrb[43].mxu0 }
 0x6db   :  { %2671 = vrot.lane.b32.xlu0 %v2670_v21, %s2849_s8 }
 0x745   :  { %v2667_v22 = vpop.permute.xlu1 %2666 }
 0x746   :  { %v2669_v23 = vunpack.i.h.bf16 %v2667_v22  ;;  %v2668_v24 = vunpack.i.l.bf16 %v2667_v22 }
 0x748   :  { %v1477_v25 = vsel %vm349_vm1, %v1349_v7, %v2668_v24  ;;  %v1478_v27 = vsel %vm349_vm1, %v1354_v6, %v2669_v23 }
 0x749   :  { %v2510_v28 = vpack.c.bf16 %v1478_v27, %v1477_v25  ;;  %v2737_v27 = vld.sshfl [vmem:[%s3550_s6] sm:$0x33 pattern:$0x76325410] }
 0x74b   :  { %2511 = vmatprep.subr.bf16.mxu0 %v2510_v28 }
 0x74c   :  { %2513 = vmatpush3.bf16.msra.mxu0 %v2510_v28 }
 0x74d   :  { %v2672_v30 = vpop.permute.xlu0 %2671 }
 0x74e   :  { %v2674_v31 = vunpack.i.h.bf16 %v2672_v30  ;;  %v2673_v3 = vunpack.i.l.bf16 %v2672_v30 }
 0x750   :  { %v1479_v33 = vsel %vm349_vm1, %v1359_v60, %v2673_v3  ;;  %v1480_v1 = vsel %vm349_vm1, %v1364_v11, %v2674_v31 }
 0x751   :  { %v2514_v34 = vpack.c.bf16 %v1480_v1, %v1479_v33 }
 0x753   :  { %2515 = vmatprep.subr.bf16.mxu0 %v2514_v34 }
 0x754   :  { %2517 = vmatpush3.bf16.msra.mxu0 %v2514_v34 }
 0x755   :  { %2386 = vmatprep.subr.msk.mxu0 %vm556_vm2, %v2967_v2 }
 0x757   :  { %2465 = vmatmul.mubr.msk.f32.vlgmr.msra.gmra.mrb[44].mxu0 %vm354_vm0, %v3042_v49 }
 0x758   :  { %2467 = vmatprep.mubr.msk.f32.mxu0 %vm354_vm0, %v3044_v50  ;;  %2387 = vmatpush1.msk.msra.mxu0 %vm556_vm2, %v2958_v0 }
 0x759   :  { %2392 = vmatprep.subr.msk.mxu0 %vm556_vm2, %v2967_v2 }
 0x75b   :  { %2468 = vmatmul.mubr.msk.f32.gmra.mrb[46].mxu0 %vm354_vm0, %v3050_v51 }
 0x75c   :  { %1734 = vmatprep.mubr.f32.mxu0 %v2852_v12 }
 0x82a   :  { %v3350_v36 = vpop.f32.mrb[44].mxu0 }
 0x82b   :  { %v1567_v49 = vmul.f32 %v3350_v36, %v3350_v36  ;;  %v3354_v50 = vpop.f32.mrb[45].mxu0 }
 0x82c   :  { %v1566_v0 = vmul.f32 %v3354_v50, %v3354_v50 }
 0x82d   :  { %1576 = vrot.lane.b32.xlu0 %v1567_v49, %s2849_s8 }
 0x82e   :  { %1574 = vrot.lane.b32.xlu1 %v1566_v0, %s2849_s8  ;;  %v3360_v2 = vpop.f32.mrb[46].mxu0 }
 0x82f   :  { %v3362_v51 = vpop.f32.mrb[47].mxu0  ;;  %v1569_v44 = vmul.f32 %v3360_v2, %v3360_v2 }
 0x830   :  { %v1568_v37 = vmul.f32 %v3362_v51, %v3362_v51 }
 0x831   :  { %1603 = vperm.xlu0 %2675, %v3076_v61  }
 0x832   :  { %1578 = vrot.lane.b32.xlu1 %v1568_v37, %s2849_s8 }
 0x835   :  { %1611 = vperm.xlu0 %2675, %v3088_v63  }
 0x836   :  { %1580 = vrot.lane.b32.xlu1 %v1569_v44, %s2849_s8 }
 0x839   :  { %2677 = vset.pattern.permute.xlu0 %v2858_v45 }
 0x83a   :  { %1607 = vperm.xlu1 %2676, %v3083_v62  }
 0x83e   :  { %1615 = vperm.xlu1 %2676, %v3095_v10  }
 0x842   :  { %2678 = vset.pattern.permute.xlu1 %v2858_v45 }
 0x89f   :  { %v1577_v46 = vpop.permute.xlu0 %1576 }
 0x8a0   :  { %v1575_v47 = vpop.permute.xlu1 %1574  ;;  %v1587_v52 = vsub.f32 %v3350_v36, %v1577_v46 }
 0x8a1   :  { %v1586_v48 = vsub.f32 %v3354_v50, %v1575_v47 }
 0x8a2   :  { %v1591_v6 = vmax.f32 %v1587_v52, 0.0 }
 0x8a3   :  { %v1590_v54 = vmax.f32 %v1586_v48, 0.0 }
 0x8a4   :  { %v1579_v53 = vpop.permute.xlu1 %1578  ;;  %v1595_v11 = vadd.f32 1e-05, %v1591_v6 }
 0x8a5   :  { %v1594_v7 = vadd.f32 1e-05, %v1590_v54  ;;  %v1588_v58 = vsub.f32 %v3362_v51, %v1579_v53 }
 0x8a7   :  { %2729 = vrsqrt.f32 %v1594_v7  ;;  %v1592_v60 = vmax.f32 %v1588_v58, 0.0 }
 0x8a8   :  { %v1581_v59 = vpop.permute.xlu1 %1580  ;;  %2731 = vrsqrt.f32 %v1595_v11 }
 0x8a9   :  { %v1589_v8 = vsub.f32 %v3360_v2, %v1581_v59  ;;  %v1596_v14 = vadd.f32 1e-05, %v1592_v60 }
 0x8ab   :  { %v1593_v13 = vmax.f32 %v1589_v8, 0.0  ;;  %2733 = vrsqrt.f32 %v1596_v14 }
 0x8ad   :  { %v1597_v15 = vadd.f32 1e-05, %v1593_v13 }
 0x8af   :  { %2735 = vrsqrt.f32 %v1597_v15 }
 0x8b0   :  { %v1604_v16 = vpop.permute.xlu0 %1603 }
 0x8b1   :  { %v2730_v17 = vpop.eup %2729 }
 0x8b2   :  { %v1618_v18 = vmul.f32 %v2730_v17, %v1604_v16  ;;  %v2732_v19 = vpop.eup %2731 }
 0x8b4   :  { %1626 = vrot.lane.b32.xlu0 %v1618_v18, %s2853_s17  ;;  %v1612_v32 = vpop.permute.xlu0 %1611 }
 0x8b5   :  { %v2734_v21 = vpop.eup %2733 }
 0x8b6   :  { %v1620_v24 = vmul.f32 %v2734_v21, %v1612_v32 }
 0x8b8   :  { %1643 = vperm.xlu0 %2677, %v3076_v61  }
 0x8b9   :  { %v1608_v20 = vpop.permute.xlu1 %1607  ;;  %v2736_v22 = vpop.eup %2735 }
 0x8ba   :  { %v1619_v56 = vmul.f32 %v2732_v19, %v1608_v20 }
 0x8bc   :  { %1628 = vrot.lane.b32.xlu1 %v1619_v56, %s2853_s17 }
 0x8bd   :  { %v1616_v23 = vpop.permute.xlu1 %1615 }
 0x8be   :  { %v1621_v25 = vmul.f32 %v2736_v22, %v1616_v23 }
 0x8c0   :  { %1630 = vrot.lane.b32.xlu1 %v1620_v24, %s2853_s17  ;;  %1632 = vrot.lane.b32.xlu0 %v1621_v25, %s2853_s17 }
 0x8c4   :  { %1647 = vperm.xlu1 %2678, %v3083_v62   ;;  %1655 = vperm.xlu0 %2677, %v3095_v10  }
 0x8c8   :  { %1651 = vperm.xlu1 %2678, %v3088_v63  }
 0x926   :  { %v1627_v61 = vpop.permute.xlu0 %1626 }
 0x927   :  { %2388 = vmatmul.mubr.msk.f32.vlgmr.msra.gmra.mrb[48].mxu0 %vm349_vm1, %v1627_v61  ;;  %v1638_v30 = vmul.f32 %v1627_v61, %v3354_v50 }
 0x928   :  { %1740 = vmatprep.mubr.f32.mxu0 %v2852_v12  ;;  %2393 = vmatpush1.msk.msra.mxu0 %vm556_vm2, %v2737_v27 }
 0x92e   :  { %v1629_v28 = vpop.permute.xlu1 %1628 }
 0x92f   :  { %2389 = vmatmul.mubr.msk.f32.gmra.mrb[50].mxu0 %vm349_vm1, %v1629_v28  ;;  %v1639_v3 = vmul.f32 %v3350_v36, %v1629_v28 }
 0x930   :  { %1746 = vmatprep.mubr.f32.mxu0 %v2852_v12 }
 0x932   :  { %v1631_v62 = vpop.permute.xlu1 %1630 }
 0x933   :  { %2390 = vmatmul.mubr.msk.f32.gmra.mrb[52].mxu0 %vm349_vm1, %v1631_v62  ;;  %v1640_v34 = vmul.f32 %v1631_v62, %v3362_v51 }
 0x934   :  { %1752 = vmatprep.mubr.f32.mxu0 %v2852_v12 }
 0x937   :  { %v1644_v63 = vpop.permute.xlu0 %1643 }
 0x938   :  { %v1658_v31 = vsub.f32 %v1644_v63, %v1638_v30 }
 0x93b   :  { %v1633_v10 = vpop.permute.xlu0 %1632 }
 0x93c   :  { %2391 = vmatmul.mubr.msk.f32.gmra.mrb[54].mxu0 %vm349_vm1, %v1633_v10  ;;  %v1641_v0 = vmul.f32 %v3360_v2, %v1633_v10 }
 0x93d   :  { %1843 = vmatprep.mubr.f32.mxu0 %v2852_v12 }
 0x940   :  { %2394 = vmatmul.mubr.msk.f32.vlgmr.msra.gmra.mrb[56].mxu0 %vm349_vm1, %v1658_v31  ;;  %v1953_v31 = vld [vmem:[#allocation5 + $0x20] sm:$0xff] }
 0x941   :  { %1849 = vmatprep.mubr.f32.mxu0 %v2852_v12 }
 0x943   :  { %v1648_v33 = vpop.permute.xlu1 %1647  ;;  %v1656_v50 = vpop.permute.xlu0 %1655 }
 0x944   :  { %v1659_v1 = vsub.f32 %v1648_v33, %v1639_v3  ;;  %v1661_v37 = vsub.f32 %v1656_v50, %v1641_v0  ;;  %v1954_v3 = vld [vmem:[#allocation5 + $0x28] sm:$0xff]  ;;  %v1955_v33 = vld [vmem:[#allocation5 + $0x30] sm:$0xff]  ;;  %v2741_v0 = vld [vmem:[%s3546_s2 + $0x18] sm:$0xff] }
 0x945   :  { %v2740_v50 = vld [vmem:[%s3546_s2 + $0x10] sm:$0xff] }
 0x946   :  { %2395 = vmatmul.mubr.msk.f32.gmra.mrb[58].mxu0 %vm349_vm1, %v1659_v1  ;;  %v1956_v1 = vld [vmem:[#allocation5 + $0x38] sm:$0xff] }
 0x947   :  { %v1652_v35 = vpop.permute.xlu1 %1651  ;;  %1855 = vmatprep.mubr.f32.mxu0 %v2852_v12 }
 0x948   :  { %v1660_v49 = vsub.f32 %v1652_v35, %v1640_v34  ;;  %v2859_v34 = vmov 5   ;;  %v2738_v35 = vld [vmem:[%s3546_s2] sm:$0xff] }
 0x949   :  { %2719 = vset.pattern.permute.xlu1 %v2859_v34  ;;  %2720 = vset.pattern.permute.xlu0 %v2859_v34 }
 0x94a   :  { %2396 = vmatmul.mubr.msk.f32.gmra.mrb[60].mxu0 %vm349_vm1, %v1660_v49  ;;  %v2739_v49 = vld [vmem:[%s3546_s2 + $0x8] sm:$0xff] }
 0x94b   :  { %1861 = vmatprep.mubr.f32.mxu0 %v2852_v12 }
 0x94e   :  { %2397 = vmatmul.mubr.msk.f32.gmra.mrb[62].mxu0 %vm349_vm1, %v1661_v37 }
 0x9fa   :  { %v1736_v36 = vpop.f32.mrb[48].mxu0 }
 0x9fb   :  { %v1759_v44 = vmul.f32 %v1736_v36, %v3288_v4  ;;  %v1738_v51 = vpop.f32.mrb[49].mxu0 }
 0x9fc   :  { %v1760_v45 = vmul.f32 %v1738_v51, %v3290_v5 }
 0xa02   :  { %v1742_v46 = vpop.f32.mrb[50].mxu0 }
 0xa03   :  { %v1761_v47 = vmul.f32 %v1742_v46, %v3294_v38  ;;  %v1744_v48 = vpop.f32.mrb[51].mxu0 }
 0xa04   :  { %v1762_v52 = vmul.f32 %v1744_v48, %v3297_v39 }
 0xa06   :  { %v1748_v2 = vpop.f32.mrb[52].mxu0 }
 0xa07   :  { %v1763_v54 = vmul.f32 %v1748_v2, %v3301_v40  ;;  %v1750_v53 = vpop.f32.mrb[53].mxu0 }
 0xa08   :  { %v1764_v7 = vmul.f32 %v1750_v53, %v3303_v41 }
 0xa0f   :  { %v1754_v58 = vpop.f32.mrb[54].mxu0 }
 0xa10   :  { %v1765_v6 = vmul.f32 %v1754_v58, %v3307_v42  ;;  %v1756_v59 = vpop.f32.mrb[55].mxu0 }
 0xa11   :  { %v1766_v4 = vmul.f32 %v1756_v59, %v3309_v43 }
 0xa13   :  { %v1845_v60 = vpop.f32.mrb[56].mxu0 }
 0xa14   :  { %v1868_v5 = vadd.f32 %v1845_v60, %v1759_v44  ;;  %v1847_v8 = vpop.f32.mrb[57].mxu0 }
 0xa15   :  { %v1869_v11 = vadd.f32 %v1847_v8, %v1760_v45 }
 0xa16   :  { %v1876_v15 = vmax.f32 %v1868_v5, 0.0 }
 0xa17   :  { %v1877_v40 = vmax.f32 %v1869_v11, 0.0 }
 0xa19   :  { %v1851_v38 = vpop.f32.mrb[58].mxu0 }
 0xa1a   :  { %v1870_v13 = vadd.f32 %v1851_v38, %v1761_v47  ;;  %v1853_v14 = vpop.f32.mrb[59].mxu0 }
 0xa1b   :  { %v1871_v39 = vadd.f32 %v1853_v14, %v1762_v52 }
 0xa1c   :  { %v1878_v16 = vmax.f32 %v1870_v13, 0.0 }
 0xa1d   :  { %v1879_v17 = vmax.f32 %v1871_v39, 0.0  ;;  %v1857_v18 = vpop.f32.mrb[60].mxu0 }
 0xa1e   :  { %v2520_v41 = vpack.c.bf16 %v1878_v16, %v1876_v15  ;;  %v1872_v19 = vadd.f32 %v1857_v18, %v1763_v54  ;;  %v1859_v20 = vpop.f32.mrb[61].mxu0  ;;  %v2679_v42 = vpack.i.bf16 %v1878_v16, %v1876_v15 }
 0xa1f   :  { %v1873_v56 = vadd.f32 %v1859_v20, %v1764_v7  ;;  %v2684_v21 = vpack.i.bf16 %v1879_v17, %v1877_v40  ;;  %v2518_v43 = vpack.c.bf16 %v1879_v17, %v1877_v40 }
 0xa20   :  { %2680 = vrot.lane.b32.xlu1 %v2679_v42, %s2855_s18  ;;  %v1880_v25 = vmax.f32 %v1872_v19, 0.0 }
 0xa21   :  { %2685 = vrot.lane.b32.xlu0 %v2684_v21, %s2855_s18  ;;  %v1863_v32 = vpop.f32.mrb[62].mxu0  ;;  %2519 = vmatprep.subr.bf16.mxu1 %v2518_v43  ;;  %v1881_v27 = vmax.f32 %v1873_v56, 0.0 }
 0xa22   :  { %v1874_v22 = vadd.f32 %v1863_v32, %v1765_v6  ;;  %v1865_v23 = vpop.f32.mrb[63].mxu0  ;;  %2521 = vmatpush1.bf16.msra.mxu1 %v2520_v41 }
 0xa23   :  { %v1875_v24 = vadd.f32 %v1865_v23, %v1766_v4 }
 0xa24   :  { %v1882_v61 = vmax.f32 %v1874_v22, 0.0 }
 0xa25   :  { %v1883_v28 = vmax.f32 %v1875_v24, 0.0 }
 0xa26   :  { %v2524_v62 = vpack.c.bf16 %v1882_v61, %v1880_v25  ;;  %v2689_v63 = vpack.i.bf16 %v1882_v61, %v1880_v25 }
 0xa27   :  { %v2694_v10 = vpack.i.bf16 %v1883_v28, %v1881_v27  ;;  %v2522_v30 = vpack.c.bf16 %v1883_v28, %v1881_v27 }
 0xa28   :  { %2690 = vrot.lane.b32.xlu1 %v2689_v63, %s2855_s18 }
 0xa29   :  { %2695 = vrot.lane.b32.xlu0 %v2694_v10, %s2855_s18  ;;  %2523 = vmatprep.subr.bf16.mxu1 %v2522_v30  ;;  %v1951_v30 = vld [vmem:[#allocation5 + $0x18] sm:$0xff] }
 0xa2a   :  { %2525 = vmatpush1.bf16.msra.mxu1 %v2524_v62  ;;  %v1949_v62 = vld [vmem:[#allocation5 + $0x8] sm:$0xff] }
 0xa2c   :  { %2700 = vrot.lane.b32.xlu1 %v2679_v42, %s2856_s19 }
 0xa2d   :  { %2705 = vrot.lane.b32.xlu0 %v2684_v21, %s2856_s19  ;;  %2398 = vmatmul.mubr.msk.f32.vlgmr.msra.gmra.mrb[16].mxu1 %vm354_vm0, %v1953_v31  ;;  %v1948_v21 = vld [vmem:[#allocation5] sm:$0xff] }
 0xa2e   :  { %2039 = vmatprep.mubr.f32.mxu1 %v2852_v12  ;;  %v2160_v31 = vld [vmem:[#allocation5 + $0x40] sm:$0xff] }
 0xa30   :  { %2710 = vrot.lane.b32.xlu1 %v2689_v63, %s2856_s19 }
 0xa31   :  { %2715 = vrot.lane.b32.xlu0 %v2694_v10, %s2856_s19  ;;  %2399 = vmatmul.mubr.msk.f32.gmra.mrb[18].mxu1 %vm354_vm0, %v1954_v3  ;;  %v2163_v3 = vld [vmem:[#allocation5 + $0x58] sm:$0xff] }
 0xa32   :  { %2045 = vmatprep.mubr.f32.mxu1 %v2852_v12 }
 0xa34   :  { %2274 = vperm.xlu1 %2719, %v2738_v35  }
 0xa35   :  { %2400 = vmatmul.mubr.msk.f32.gmra.mrb[20].mxu1 %vm354_vm0, %v1955_v33  ;;  %2278 = vperm.xlu0 %2720, %v2739_v49  }
 0xa36   :  { %2051 = vmatprep.mubr.f32.mxu1 %v2852_v12 }
 0xa38   :  { %2282 = vperm.xlu1 %2719, %v2740_v50  }
 0xa39   :  { %2401 = vmatmul.mubr.msk.f32.gmra.mrb[22].mxu1 %vm354_vm0, %v1956_v1 }
 0xa3a   :  { %2134 = vmatprep.mubr.f32.mxu1 %v2852_v12 }
 0xa3c   :  { %2286 = vperm.xlu1 %2719, %v2741_v0   ;;  %v2742_v0 = vld [vmem:[%s3544_s0] sm:$0xff] }
 0xa92   :  { %v2681_v37 = vpop.permute.xlu1 %2680 }
 0xa93   :  { %v2683_v36 = vunpack.i.h.bf16 %v2681_v37  ;;  %v2682_v44 = vunpack.i.l.bf16 %v2681_v37  ;;  %v2686_v51 = vpop.permute.xlu0 %2685 }
 0xa94   :  { %v2688_v45 = vunpack.i.h.bf16 %v2686_v51  ;;  %v2687_v46 = vunpack.i.l.bf16 %v2686_v51 }
 0xa96   :  { %v1900_v47 = vsel %vm791_vm3, %v2682_v44, %v2687_v46  ;;  %v1901_v48 = vsel %vm791_vm3, %v2683_v36, %v2688_v45  ;;  %v1904_v52 = vsel %vm791_vm3, %v2687_v46, %v2682_v44  ;;  %v1905_v2 = vsel %vm791_vm3, %v2688_v45, %v2683_v36  ;;  %v2743_v36 = vld [vmem:[%s3544_s0 + $0x8] sm:$0xff] }
 0xa97   :  { %v2526_v54 = vpack.c.bf16 %v1901_v48, %v1900_v47  ;;  %v2529_v53 = vpack.c.bf16 %v1905_v2, %v1904_v52  ;;  %v2744_v48 = vld [vmem:[%s3544_s0 + $0x10] sm:$0xff]  ;;  %v2745_v2 = vld [vmem:[%s3544_s0 + $0x18] sm:$0xff] }
 0xa99   :  { %2528 = vmatprep.subr.msk.bf16.mxu1 %vm3183_vm6, %v2526_v54 }
 0xa9a   :  { %v2691_v7 = vpop.permute.xlu1 %2690  ;;  %2531 = vmatpush1.bf16.msk.msra.mxu1 %vm3187_vm7, %v2529_v53 }
 0xa9b   :  { %v2693_v58 = vunpack.i.h.bf16 %v2691_v7  ;;  %v2692_v6 = vunpack.i.l.bf16 %v2691_v7  ;;  %v2696_v59 = vpop.permute.xlu0 %2695 }
 0xa9c   :  { %v2698_v4 = vunpack.i.h.bf16 %v2696_v59  ;;  %v2697_v60 = vunpack.i.l.bf16 %v2696_v59  ;;  %v2746_v59 = vld [vmem:[%s3544_s0 + $0x20] sm:$0xff] }
 0xa9e   :  { %v1902_v5 = vsel %vm791_vm3, %v2692_v6, %v2697_v60  ;;  %v1903_v8 = vsel %vm791_vm3, %v2693_v58, %v2698_v4  ;;  %v1906_v11 = vsel %vm791_vm3, %v2697_v60, %v2692_v6  ;;  %v1907_v38 = vsel %vm791_vm3, %v2698_v4, %v2693_v58  ;;  %v2701_v13 = vpop.permute.xlu1 %2700  ;;  %v2747_v60 = vld [vmem:[%s3544_s0 + $0x28] sm:$0xff] }
 0xa9f   :  { %v2532_v14 = vpack.c.bf16 %v1903_v8, %v1902_v5  ;;  %v2535_v39 = vpack.c.bf16 %v1907_v38, %v1906_v11  ;;  %v2703_v15 = vunpack.i.h.bf16 %v2701_v13  ;;  %v2702_v16 = vunpack.i.l.bf16 %v2701_v13  ;;  %v2706_v40 = vpop.permute.xlu0 %2705 }
 0xaa0   :  { %v2708_v17 = vunpack.i.h.bf16 %v2706_v40  ;;  %v2707_v18 = vunpack.i.l.bf16 %v2706_v40 }
 0xaa1   :  { %2534 = vmatprep.subr.msk.bf16.mxu1 %vm3183_vm6, %v2532_v14 }
 0xaa2   :  { %v1932_v41 = vsel %vm828_vm8, %v2702_v16, %v2707_v18  ;;  %v1933_v19 = vsel %vm828_vm8, %v2703_v15, %v2708_v17  ;;  %v1936_v20 = vsel %vm828_vm8, %v2707_v18, %v2702_v16  ;;  %v1937_v42 = vsel %vm828_vm8, %v2708_v17, %v2703_v15  ;;  %v2711_v56 = vpop.permute.xlu1 %2710  ;;  %2537 = vmatpush1.bf16.msk.msra.mxu1 %vm3187_vm7, %v2535_v39  ;;  %v2748_v39 = vld [vmem:[%s3544_s0 + $0x30] sm:$0xff]  ;;  %v2749_v16 = vld [vmem:[%s3544_s0 + $0x38] sm:$0xff] }
 0xaa3   :  { %v2538_v43 = vpack.c.bf16 %v1937_v42, %v1936_v20  ;;  %v2541_v26 = vpack.c.bf16 %v1933_v19, %v1932_v41  ;;  %v2713_v32 = vunpack.i.h.bf16 %v2711_v56  ;;  %v2712_v22 = vunpack.i.l.bf16 %v2711_v56  ;;  %v2716_v23 = vpop.permute.xlu0 %2715 }
 0xaa4   :  { %v2718_v24 = vunpack.i.h.bf16 %v2716_v23  ;;  %v2717_v25 = vunpack.i.l.bf16 %v2716_v23 }
 0xaa5   :  { %2410 = vmatmul.mubr.msk.f32.vlgmr.msra.gmra.mrb[16].mxu1 %vm354_vm0, %v1948_v21  ;;  %2540 = vmatprep.subr.msk.bf16.mxu1 %vm3224_vm11, %v2538_v43 }
 0xaa6   :  { %v1934_v61 = vsel %vm828_vm8, %v2712_v22, %v2717_v25  ;;  %v1935_v29 = vsel %vm828_vm8, %v2713_v32, %v2718_v24  ;;  %v1938_v27 = vsel %vm828_vm8, %v2717_v25, %v2712_v22  ;;  %v1939_v28 = vsel %vm828_vm8, %v2718_v24, %v2713_v32  ;;  %2543 = vmatpush1.bf16.msk.msra.mxu1 %vm3228_vm12, %v2541_v26 }
 0xaa7   :  { %v2544_v63 = vpack.c.bf16 %v1939_v28, %v1938_v27  ;;  %v2547_v10 = vpack.c.bf16 %v1935_v29, %v1934_v61  ;;  %2140 = vmatprep.mubr.f32.mxu1 %v2852_v12 }
 0xaa9   :  { %2411 = vmatmul.mubr.msk.f32.gmra.mrb[18].mxu1 %vm354_vm0, %v1949_v62  ;;  %2546 = vmatprep.subr.msk.bf16.mxu1 %vm3224_vm11, %v2544_v63 }
 0xaaa   :  { %2549 = vmatpush1.bf16.msk.msra.mxu1 %vm3228_vm12, %v2547_v10  ;;  %2146 = vmatprep.mubr.f32.mxu1 %v2852_v12 }
 0xaad   :  { %2412 = vmatmul.mubr.msk.f32.gmra.mrb[20].mxu1 %vm354_vm0, %v1950_v57 }
 0xaae   :  { %2152 = vmatprep.mubr.f32.mxu1 %v2852_v12 }
 0xab1   :  { %2413 = vmatmul.mubr.msk.f32.gmra.mrb[22].mxu1 %vm354_vm0, %v1951_v30 }
 0xab2   :  { %2240 = vmatprep.mubr.f32.mxu1 %v2852_v12 }
 0xab3   :  { %v2275_v33 = vpop.permute.xlu1 %2274 }
 0xab4   :  { %v2279_v50 = vpop.permute.xlu0 %2278 }
 0xab5   :  { %2422 = vmatmul.mubr.msk.f32.vlgmr.msra.gmra.mrb[16].mxu1 %vm354_vm0, %v2160_v31 }
 0xab6   :  { %2246 = vmatprep.mubr.f32.mxu1 %v2852_v12 }
 0xab7   :  { %v2283_v47 = vpop.permute.xlu1 %2282 }
 0xab9   :  { %2423 = vmatmul.mubr.msk.f32.gmra.mrb[18].mxu1 %vm354_vm0, %v2161_v55 }
 0xaba   :  { %2252 = vmatprep.mubr.f32.mxu1 %v2852_v12 }
 0xabb   :  { %v2287_v8 = vpop.permute.xlu1 %2286 }
 0xabd   :  { %2424 = vmatmul.mubr.msk.f32.gmra.mrb[20].mxu1 %vm354_vm0, %v2162_v9 }
 0xabe   :  { %2258 = vmatprep.mubr.f32.mxu1 %v2852_v12 }
 0xac1   :  { %2425 = vmatmul.mubr.msk.f32.gmra.mrb[22].mxu1 %vm354_vm0, %v2163_v3 }
 0xb88   :  { %v2242_v1 = vpop.f32.mrb[16].mxu1 }
 0xb89   :  { %v2289_v34 = vadd.f32 %v2275_v33, %v2242_v1  ;;  %v2244_v35 = vpop.f32.mrb[17].mxu1 }
 0xb8a   :  { %v2290_v49 = vadd.f32 %v2275_v33, %v2244_v35 }
 0xb8b   :  { %v2297_v37 = vadd.f32 %v2742_v0, %v2289_v34 }
 0xb8c   :  { %v2298_v44 = vadd.f32 %v2743_v36, %v2290_v49  ;;  %v2248_v12 = vpop.f32.mrb[18].mxu1 }
 0xb8d   :  { %2305 = vst [vmem:[#allocation8] sm:$0xff] %v2297_v37  ;;  %v2291_v51 = vadd.f32 %v2279_v50, %v2248_v12  ;;  %v2250_v45 = vpop.f32.mrb[19].mxu1 }
 0xb8e   :  { %2306 = vst [vmem:[#allocation8 + $0x8] sm:$0xff] %v2298_v44  ;;  %v2292_v46 = vadd.f32 %v2279_v50, %v2250_v45 }
 0xb8f   :  { %v2299_v52 = vadd.f32 %v2744_v48, %v2291_v51 }
 0xb90   :  { %v2300_v54 = vadd.f32 %v2745_v2, %v2292_v46  ;;  %v2254_v53 = vpop.f32.mrb[20].mxu1 }
 0xb91   :  { %2307 = vst [vmem:[#allocation8 + $0x10] sm:$0xff] %v2299_v52  ;;  %v2293_v7 = vadd.f32 %v2283_v47, %v2254_v53  ;;  %v2256_v58 = vpop.f32.mrb[21].mxu1 }
 0xb92   :  { %2308 = vst [vmem:[#allocation8 + $0x18] sm:$0xff] %v2300_v54  ;;  %v2294_v6 = vadd.f32 %v2283_v47, %v2256_v58 }
 0xb93   :  { %v2301_v4 = vadd.f32 %v2746_v59, %v2293_v7 }
 0xb94   :  { %v2302_v5 = vadd.f32 %v2747_v60, %v2294_v6  ;;  %v2260_v11 = vpop.f32.mrb[22].mxu1 }
 0xb95   :  { %2309 = vst [vmem:[#allocation8 + $0x20] sm:$0xff] %v2301_v4  ;;  %v2295_v38 = vadd.f32 %v2287_v8, %v2260_v11  ;;  %v2262_v13 = vpop.f32.mrb[23].mxu1 }
 0xb96   :  { %2310 = vst [vmem:[#allocation8 + $0x28] sm:$0xff] %v2302_v5  ;;  %v2296_v14 = vadd.f32 %v2287_v8, %v2262_v13 }
 0xb97   :  { %v2303_v15 = vadd.f32 %v2748_v39, %v2295_v38 }
 0xb98   :  { %v2304_v40 = vadd.f32 %v2749_v16, %v2296_v14 }
 0xb99   :  { %2311 = vst [vmem:[#allocation8 + $0x30] sm:$0xff] %v2303_v15 }
 0xb9a   :  { %2312 = vst [vmem:[#allocation8 + $0x38] sm:$0xff] %v2304_v40 }
 0xb9b   :  { %2827 = shalt.err (!%p2824_p0)
}
 0xb9c   :  { %s2828_s6 = scalar_lea.hbm %s3551_s7, 1024 }
 0xb9d   :  { %p2829_p1 = scmp.ne.s32.totalorder %s3551_s7, %s2828_s6  ;;  %p2832_p2 = scmp.lt.u32.totalorder %s2828_s6, %s3551_s7 }
 0xb9f   :  { %p2834_p3 = pnand %p2832_p2, %p2829_p1 }
 0xba1   :  { %2837 = shalt.err (!%p2834_p3)
}
 0xba2   :  { %s2861_s29 = smov 256   ;;  %s2862_s30 = smov 16  }
 0xba3   :  { %2324 = dma.vmem_to_hbm [thread:$0]  %s2319_s14, 1024, %s3551_s7, [#allocation4], %s2861_s29, %s2861_s29, %s2862_s30  }
 0xba4   :  { %2842 = dma.done.wait [#allocation4], 1024  }
 0xba5   :  { %2843 = vsyncadd [#allocation4], 4294966272 }
 0xba6   :  { %2328 = vsyncpa [#allocation3], 1 }
 0xba7   :  { %2329 = vsyncpa [#allocation6], 1 }
 0xba8   :  { %2330 = vsyncpa [#allocation4], 1 }

</bundles_post_ra>
